<compile_context>
chip_gen: v7x
topology: tpu7x:2x2x1
jax: 0.10.0
libtpu: 0.0.40
codegen_flags: <defaults>
</compile_context>

<pallas_src>
import numpy as np
import jax
import jax.numpy as jnp
from jax.experimental import pallas as pl
from jax.experimental.pallas import tpu as pltpu

B_PAD = 8      # sublane padding for the batch dim
F_PAD = 128    # lane padding: 4 GRU lane-bands of 32 lanes each
BAND = 32      # lanes per GRU band
N_GRU = 4      # dp_fw, dp_bw, cp_fw, cp_bw


# ----------------------------------------------------------------------------
# Pallas kernel: 4 GRU recurrences (lane-band block-diagonal) + FC head
# ----------------------------------------------------------------------------
def _fused_kernel(x_ref, wih_ref, whh_ref, bih_ref, bhh_ref, lens_ref,
                  stat_ref, wcomb_ref, bhead_ref,
                  out_ref, gx_ref):
    """
    x_ref:    (T*8, 128)  bf16  time-major packed inputs (row block t*8..t*8+7)
    wih_ref:  (128, 384)  bf16  block-diag input->hidden, gates [r|z|n] fused
    whh_ref:  (128, 384)  bf16  block-diag hidden->hidden, gates fused
    bih_ref:  (1, 384)    f32
    bhh_ref:  (1, 384)    f32
    lens_ref: (1, 128)    i32   per-lane valid sequence length (per GRU band)
    stat_ref: (8, 128)    f32   padded static features
    wcomb_ref:(256, 128)  f32   folded head weights for [h | stat] (col 0 real)
    bhead_ref:(1, 128)    f32   folded head bias (column 0 real)
    out_ref:  (8, 128)    f32   out[:B, 0] is the result
    gx_ref:   (T*8, 384)  f32   scratch: precomputed input-path gate preacts
    """
    Bp, Fp = out_ref.shape
    T = x_ref.shape[0] // Bp

    # --- input->hidden path hoisted out of the recurrence: ONE wide matmul ---
    gx = jnp.dot(x_ref[...], wih_ref[...], preferred_element_type=jnp.float32)
    gx_ref[...] = gx + bih_ref[...]                       # (T*8, 384) f32

    bhh = bhh_ref[...]                                    # hoisted bias load
    lens = lens_ref[...]                                  # hoisted (1,128) i32

    def step(t, h):
        # single fused hidden->hidden matmul for all 3 gates of all 4 GRUs
        gh = jnp.dot(h.astype(jnp.bfloat16), whh_ref[...],
                     preferred_element_type=jnp.float32) + bhh      # (8, 384)
        row = pl.multiple_of(t * Bp, Bp)
        gxt = gx_ref[pl.ds(row, Bp), :]                             # (8, 384)
        r = jax.nn.sigmoid(gxt[:, :Fp] + gh[:, :Fp])
        z = jax.nn.sigmoid(gxt[:, Fp:2 * Fp] + gh[:, Fp:2 * Fp])
        n = jnp.tanh(gxt[:, 2 * Fp:] + r * gh[:, 2 * Fp:])
        h_cand = (1.0 - z) * n + z * h
        # padded timesteps must NOT move h (z=sigmoid(b) != 0 on zero input);
        # mask is computed from the tiny per-lane length vector -> pure VPU.
        mf = (t < lens).astype(jnp.float32)                         # (1, 128)
        return mf * h_cand + (1.0 - mf) * h

    h0 = jnp.zeros((Bp, Fp), jnp.float32)
    h = jax.lax.fori_loop(0, T, step, h0, unroll=True)

    # --- FC head (fc_dp, fc_cp, fc_all algebraically folded) as epilogue ---
    hs = jnp.concatenate([h, stat_ref[...]], axis=-1)               # (8, 256)
    out_ref[...] = (jnp.dot(hs, wcomb_ref[...],
                            preferred_element_type=jnp.float32)
                    + bhead_ref[...])


# ----------------------------------------------------------------------------
# One-time parameter packing (outside jit)
# ----------------------------------------------------------------------------
def pack_params(params, T_dp, T_cp):
    edp = params["embed_dp"].shape[1]
    ecp = params["embed_cp"].shape[1]
    Hdp, Hcp = edp + 1, ecp + 1
    assert max(Hdp, Hcp) <= BAND and N_GRU * BAND == F_PAD

    gru_order = [("gru_dp_fw", Hdp, T_dp), ("gru_dp_bw", Hdp, T_dp),
                 ("gru_cp_fw", Hcp, T_cp), ("gru_cp_bw", Hcp, T_cp)]

    wih = np.zeros((F_PAD, 3 * F_PAD), np.float32)
    whh = np.zeros((F_PAD, 3 * F_PAD), np.float32)
    bih = np.zeros((1, 3 * F_PAD), np.float32)
    bhh = np.zeros((1, 3 * F_PAD), np.float32)
    lens = np.zeros((1, F_PAD), np.int32)

    for g, (name, H, T_g) in enumerate(gru_order):
        w_ih, w_hh, b_ih, b_hh = [np.asarray(a, np.float32) for a in params[name]]
        base = g * BAND
        for k in range(3):                      # torch gate order: r, z, n
            col = k * F_PAD + base
            wih[base:base + H, col:col + H] = w_ih[k * H:(k + 1) * H, :].T
            whh[base:base + H, col:col + H] = w_hh[k * H:(k + 1) * H, :].T
            bih[0, col:col + H] = b_ih[k * H:(k + 1) * H]
            bhh[0, col:col + H] = b_hh[k * H:(k + 1) * H]
        lens[0, base:base + BAND] = T_g

    # Fold fc_dp / fc_cp / fc_all:
    #   out = stat @ w_all[:ns] + w_all[ns]*(h_dp.w_dp + b_dp)
    #         + w_all[ns+1]*(h_cp.w_cp + b_cp) + b_all
    w_dp = np.asarray(params["fc_dp_w"], np.float32)
    w_cp = np.asarray(params["fc_cp_w"], np.float32)
    w_all = np.asarray(params["fc_all_w"], np.float32)
    b_dp = float(np.asarray(params["fc_dp_b"])[0])
    b_cp = float(np.asarray(params["fc_cp_b"])[0])
    b_all = float(np.asarray(params["fc_all_b"])[0])
    ns = w_all.shape[1] - 2

    # combined head weight for [h (128 lanes) | stat (128 lanes)] -> 1 real col
    wcomb = np.zeros((2 * F_PAD, F_PAD), np.float32)
    wcomb[0 * BAND:0 * BAND + Hdp, 0] = w_all[0, ns] * w_dp[0, :Hdp]       # h_dp_fw
    wcomb[1 * BAND:1 * BAND + Hdp, 0] = w_all[0, ns] * w_dp[0, Hdp:]       # h_dp_bw
    wcomb[2 * BAND:2 * BAND + Hcp, 0] = w_all[0, ns + 1] * w_cp[0, :Hcp]   # h_cp_fw
    wcomb[3 * BAND:3 * BAND + Hcp, 0] = w_all[0, ns + 1] * w_cp[0, Hcp:]   # h_cp_bw
    wcomb[F_PAD:F_PAD + ns, 0] = w_all[0, :ns]                             # stat
    bhead = np.zeros((1, F_PAD), np.float32)
    bhead[0, 0] = b_all + w_all[0, ns] * b_dp + w_all[0, ns + 1] * b_cp

    return dict(
        embed_dp=params["embed_dp"], embed_cp=params["embed_cp"],
        wih=jnp.asarray(wih, jnp.bfloat16), whh=jnp.asarray(whh, jnp.bfloat16),
        bih=jnp.asarray(bih), bhh=jnp.asarray(bhh),
        lens=jnp.asarray(lens),
        wcomb=jnp.asarray(wcomb), bhead=jnp.asarray(bhead),
    )


# ----------------------------------------------------------------------------
# Forward (one pallas_call per forward)
# ----------------------------------------------------------------------------
def abs_time_to_delta(times):
    delta = jnp.concatenate([times[:, :1], times[:, 1:] - times[:, :-1]], axis=1)
    return jnp.maximum(delta, 0.0)


def _concat_inputs(p, dp, cp, dp_t, cp_t):
    emb_dp = p["embed_dp"][dp]
    emb_cp = p["embed_cp"][cp]
    dp_fw = jnp.concatenate([emb_dp, abs_time_to_delta(dp_t)[..., None]], -1)
    cp_fw = jnp.concatenate([emb_cp, abs_time_to_delta(cp_t)[..., None]], -1)
    dp_bw = jnp.concatenate([jnp.flip(emb_dp, 1),
                             abs_time_to_delta(jnp.flip(dp_t, 1))[..., None]], -1)
    cp_bw = jnp.concatenate([jnp.flip(emb_cp, 1),
                             abs_time_to_delta(jnp.flip(cp_t, 1))[..., None]], -1)
    return dp_fw, dp_bw, cp_fw, cp_bw


def _band(x_btc, T_max):
    # (B, T, F) -> time-major (T_max, B_PAD, BAND), zero padded
    x_tbf = jnp.transpose(x_btc, (1, 0, 2)).astype(jnp.float32)
    T, B, F = x_tbf.shape
    return jnp.pad(x_tbf, ((0, T_max - T), (0, B_PAD - B), (0, BAND - F)))


@jax.jit
def forward(packed, stat, dp, cp, dp_t, cp_t):
    # TODO(synk): nn.Dropout(p=0.5) is identity in eval mode (deterministic fwd).
    dp_fw, dp_bw, cp_fw, cp_bw = _concat_inputs(packed, dp, cp, dp_t, cp_t)
    B, ns = stat.shape
    T_max = max(dp.shape[1], cp.shape[1])

    x = jnp.concatenate([_band(dp_fw, T_max), _band(dp_bw, T_max),
                         _band(cp_fw, T_max), _band(cp_bw, T_max)], axis=-1)
    x = x.reshape(T_max * B_PAD, F_PAD).astype(jnp.bfloat16)
    stat_p = jnp.pad(stat.astype(jnp.float32), ((0, B_PAD - B), (0, F_PAD - ns)))

    vmem = pl.BlockSpec(memory_space=pltpu.MemorySpace.VMEM)
    out_p = pl.pallas_call(
        _fused_kernel,
        out_shape=jax.ShapeDtypeStruct((B_PAD, F_PAD), jnp.float32),
        in_specs=[vmem] * 9,
        out_specs=vmem,
        scratch_shapes=[pltpu.VMEM((T_max * B_PAD, 3 * F_PAD), jnp.float32)],
    )(x, packed["wih"], packed["whh"], packed["bih"], packed["bhh"],
      packed["lens"], stat_p, packed["wcomb"], packed["bhead"])

    return out_p[:B, 0], []   # torch .squeeze() -> (B,)


# ----------------------------------------------------------------------------
# Pure-JAX reference (f32) for correctness check
# ----------------------------------------------------------------------------
def _ref_gru_last(x_btc, gru_params):
    w_ih, w_hh, b_ih, b_hh = gru_params

    def cell(h, x_t):
        gi = x_t @ w_ih.T + b_ih
        gh = h @ w_hh.T + b_hh
        i_r, i_z, i_n = jnp.split(gi, 3, -1)
        h_r, h_z, h_n = jnp.split(gh, 3, -1)
        r = jax.nn.sigmoid(i_r + h_r)
        z = jax.nn.sigmoid(i_z + h_z)
        n = jnp.tanh(i_n + r * h_n)
        return (1.0 - z) * n + z * h, None

    h0 = jnp.zeros((x_btc.shape[0], w_hh.shape[1]), jnp.float32)
    h, _ = jax.lax.scan(cell, h0, jnp.transpose(x_btc, (1, 0, 2)))
    return h


def reference_forward(params, stat, dp, cp, dp_t, cp_t):
    dp_fw, dp_bw, cp_fw, cp_bw = _concat_inputs(params, dp, cp, dp_t, cp_t)
    h_dp = jnp.concatenate([_ref_gru_last(dp_fw, params["gru_dp_fw"]),
                            _ref_gru_last(dp_bw, params["gru_dp_bw"])], -1)
    h_cp = jnp.concatenate([_ref_gru_last(cp_fw, params["gru_cp_fw"]),
                            _ref_gru_last(cp_bw, params["gru_cp_bw"])], -1)
    score_dp = h_dp @ params["fc_dp_w"].T + params["fc_dp_b"]
    score_cp = h_cp @ params["fc_cp_w"].T + params["fc_cp_b"]
    allv = jnp.concatenate([stat, score_dp, score_cp], axis=1)
    return (allv @ params["fc_all_w"].T + params["fc_all_b"]).squeeze()


# ----------------------------------------------------------------------------
# Deterministic parameter construction (matches module __init__ shapes)
# ----------------------------------------------------------------------------
def init_params(key, num_static, num_dp_codes, num_cp_codes):
    embed_dp_dim = int(np.ceil(num_dp_codes ** 0.25))
    embed_cp_dim = int(np.ceil(num_cp_codes ** 0.25))
    Hdp = embed_dp_dim + 1
    Hcp = embed_cp_dim + 1
    keys = iter(jax.random.split(key, 24))

    def nrm(shape, scale=0.1):
        return scale * jax.random.normal(next(keys), shape, dtype=jnp.float32)

    def gru(H):  # input_size == hidden_size == H for every GRU in this module
        return (nrm((3 * H, H)), nrm((3 * H, H)), nrm((3 * H,)), nrm((3 * H,)))

    embed_dp = nrm((num_dp_codes, embed_dp_dim)).at[0].set(0.0)  # padding_idx=0
    embed_cp = nrm((num_cp_codes, embed_cp_dim)).at[0].set(0.0)

    return dict(
        embed_dp=embed_dp, embed_cp=embed_cp,
        gru_dp_fw=gru(Hdp), gru_cp_fw=gru(Hcp),
        gru_dp_bw=gru(Hdp), gru_cp_bw=gru(Hcp),
        fc_dp_w=nrm((1, 2 * Hdp)), fc_dp_b=nrm((1,)),
        fc_cp_w=nrm((1, 2 * Hcp)), fc_cp_b=nrm((1,)),
        fc_all_w=nrm((1, num_static + 2)), fc_all_b=nrm((1,)),
    ), embed_dp_dim, embed_cp_dim


if __name__ == "__main__":
    num_static, num_dp_codes, num_cp_codes = 8, 100, 60
    B, T_dp, T_cp = 2, 8, 6

    key = jax.random.PRNGKey(0)
    pkey, dkey = jax.random.split(key)
    params, edp, ecp = init_params(pkey, num_static, num_dp_codes, num_cp_codes)
    packed = pack_params(params, T_dp, T_cp)   # one-time packing, outside jit

    k1, k2, k3, k4, k5 = jax.random.split(dkey, 5)
    stat = jax.random.normal(k1, (B, num_static), dtype=jnp.float32)
    dp = jax.random.randint(k2, (B, T_dp), 0, num_dp_codes)
    cp = jax.random.randint(k3, (B, T_cp), 0, num_cp_codes)
    dp_t = jnp.cumsum(jax.random.uniform(k4, (B, T_dp), dtype=jnp.float32), axis=1)
    cp_t = jnp.cumsum(jax.random.uniform(k5, (B, T_cp), dtype=jnp.float32), axis=1)

    out, aux = forward(packed, stat, dp, cp, dp_t, cp_t)
    out = jax.block_until_ready(out)
    assert out.shape == (B,), out.shape
    assert bool(jnp.all(jnp.isfinite(out)))

    ref = reference_forward(params, stat, dp, cp, dp_t, cp_t)
    max_err = float(jnp.max(jnp.abs(out - ref)))
    assert max_err < 5e-2, f"mismatch vs reference: {max_err}"
    print("KERNEL_OK")
</pallas_src>

<mosaic_0001>
module attributes {stable_mosaic.version = 11 : i64} {
  func.func @_fused_kernel(%arg0: memref<64x128xbf16, #tpu.memory_space<vmem>>, %arg1: memref<128x384xbf16, #tpu.memory_space<vmem>>, %arg2: memref<128x384xbf16, #tpu.memory_space<vmem>>, %arg3: memref<1x384xf32, #tpu.memory_space<vmem>>, %arg4: memref<1x384xf32, #tpu.memory_space<vmem>>, %arg5: memref<1x128xi32, #tpu.memory_space<vmem>>, %arg6: memref<8x128xf32, #tpu.memory_space<vmem>>, %arg7: memref<256x128xf32, #tpu.memory_space<vmem>>, %arg8: memref<1x128xf32, #tpu.memory_space<vmem>>, %arg9: memref<8x128xf32, #tpu.memory_space<vmem>>, %arg10: memref<64x384xf32, #tpu.memory_space<vmem>>) attributes {dimension_semantics = [], scalar_prefetch = 0 : i64, scratch_operands = 1 : i64, tpu.core_type = #tpu.core_type<tc>} {
    %c0 = arith.constant 0 : index
    %c0_0 = arith.constant 0 : index
    %0 = vector.load %arg0[%c0, %c0_0] : memref<64x128xbf16, #tpu.memory_space<vmem>>, vector<64x128xbf16>
    %c0_1 = arith.constant 0 : index
    %c0_2 = arith.constant 0 : index
    %1 = vector.load %arg1[%c0_1, %c0_2] : memref<128x384xbf16, #tpu.memory_space<vmem>>, vector<128x384xbf16>
    %cst = arith.constant dense<0.000000e+00> : vector<64x384xf32>
    %2 = tpu.matmul %0, %1, %cst {dimension_numbers = #tpu.dot_dimension_numbers<[1], [0], [0], [1], [0, 0, 1, 1], [], []>} : vector<64x128xbf16>, vector<128x384xbf16>, vector<64x384xf32> -> vector<64x384xf32>
    %c0_3 = arith.constant 0 : index
    %c0_4 = arith.constant 0 : index
    %3 = vector.load %arg3[%c0_3, %c0_4] : memref<1x384xf32, #tpu.memory_space<vmem>>, vector<1x384xf32>
    %4 = vector.broadcast %3 : vector<1x384xf32> to vector<64x384xf32>
    %5 = arith.addf %2, %4 : vector<64x384xf32>
    %c0_5 = arith.constant 0 : index
    %c0_6 = arith.constant 0 : index
    %6 = vector.load %arg10[%c0_5, %c0_6] : memref<64x384xf32, #tpu.memory_space<vmem>>, vector<64x384xf32>
    tpu.vector_store %arg10[%c0_5, %c0_6], %5 {strides = array<i32>} : memref<64x384xf32, #tpu.memory_space<vmem>>, vector<64x384xf32>,
    %c0_7 = arith.constant 0 : index
    %c0_8 = arith.constant 0 : index
    %7 = vector.load %arg4[%c0_7, %c0_8] : memref<1x384xf32, #tpu.memory_space<vmem>>, vector<1x384xf32>
    %c0_9 = arith.constant 0 : index
    %c0_10 = arith.constant 0 : index
    %8 = vector.load %arg5[%c0_9, %c0_10] : memref<1x128xi32, #tpu.memory_space<vmem>>, vector<1x128xi32>
    %cst_11 = arith.constant 0.000000e+00 : f32
    %9 = vector.broadcast %cst_11 : f32 to vector<8x128xf32>
    %c0_i32 = arith.constant 0 : i32
    %10 = arith.truncf %9 : vector<8x128xf32> to vector<8x128xbf16>
    %c0_12 = arith.constant 0 : index
    %c0_13 = arith.constant 0 : index
    %11 = vector.load %arg2[%c0_12, %c0_13] : memref<128x384xbf16, #tpu.memory_space<vmem>>, vector<128x384xbf16>
    %cst_14 = arith.constant dense<0.000000e+00> : vector<8x384xf32>
    %12 = tpu.matmul %10, %11, %cst_14 {dimension_numbers = #tpu.dot_dimension_numbers<[1], [0], [0], [1], [0, 0, 1, 1], [], []>} : vector<8x128xbf16>, vector<128x384xbf16>, vector<8x384xf32> -> vector<8x384xf32>
    %13 = vector.broadcast %7 : vector<1x384xf32> to vector<8x384xf32>
    %14 = arith.addf %12, %13 : vector<8x384xf32>
    %c8_i32 = arith.constant 8 : i32
    %15 = arith.muli %c0_i32, %c8_i32 : i32
    %16 = tpu.assume_multiple %15, 8 : i32
    %17 = arith.index_cast %16 : i32 to index
    %c0_15 = arith.constant 0 : index
    %18 = vector.load %arg10[%17, %c0_15] : memref<64x384xf32, #tpu.memory_space<vmem>>, vector<8x384xf32>
    %19 = vector.extract_strided_slice %18 {offsets = [0, 0], sizes = [8, 128], strides = [1, 1]} : vector<8x384xf32> to vector<8x128xf32>
    %20 = vector.extract_strided_slice %14 {offsets = [0, 0], sizes = [8, 128], strides = [1, 1]} : vector<8x384xf32> to vector<8x128xf32>
    %21 = arith.addf %19, %20 : vector<8x128xf32>
    %22 = arith.negf %21 : vector<8x128xf32>
    %23 = math.exp %22 : vector<8x128xf32>
    %cst_16 = arith.constant 1.000000e+00 : f32
    %24 = vector.broadcast %cst_16 : f32 to vector<8x128xf32>
    %25 = arith.addf %24, %23 : vector<8x128xf32>
    %26 = arith.divf %24, %25 : vector<8x128xf32>
    %27 = vector.extract_strided_slice %18 {offsets = [0, 128], sizes = [8, 128], strides = [1, 1]} : vector<8x384xf32> to vector<8x128xf32>
    %28 = vector.extract_strided_slice %14 {offsets = [0, 128], sizes = [8, 128], strides = [1, 1]} : vector<8x384xf32> to vector<8x128xf32>
    %29 = arith.addf %27, %28 : vector<8x128xf32>
    %30 = arith.negf %29 : vector<8x128xf32>
    %31 = math.exp %30 : vector<8x128xf32>
    %cst_17 = arith.constant 1.000000e+00 : f32
    %32 = vector.broadcast %cst_17 : f32 to vector<8x128xf32>
    %33 = arith.addf %32, %31 : vector<8x128xf32>
    %34 = arith.divf %32, %33 : vector<8x128xf32>
    %35 = vector.extract_strided_slice %18 {offsets = [0, 256], sizes = [8, 128], strides = [1, 1]} : vector<8x384xf32> to vector<8x128xf32>
    %36 = vector.extract_strided_slice %14 {offsets = [0, 256], sizes = [8, 128], strides = [1, 1]} : vector<8x384xf32> to vector<8x128xf32>
    %37 = arith.mulf %26, %36 : vector<8x128xf32>
    %38 = arith.addf %35, %37 : vector<8x128xf32>
    %39 = math.tanh %38 : vector<8x128xf32>
    %cst_18 = arith.constant 1.000000e+00 : f32
    %40 = vector.broadcast %cst_18 : f32 to vector<8x128xf32>
    %41 = arith.subf %40, %34 : vector<8x128xf32>
    %42 = arith.mulf %41, %39 : vector<8x128xf32>
    %43 = arith.mulf %34, %9 : vector<8x128xf32>
    %44 = arith.addf %42, %43 : vector<8x128xf32>
    %45 = vector.broadcast %c0_i32 : i32 to vector<1x128xi32>
    %46 = arith.cmpi slt, %45, %8 : vector<1x128xi32>
    %47 = arith.extui %46 : vector<1x128xi1> to vector<1x128xi32>
    %48 = arith.sitofp %47 : vector<1x128xi32> to vector<1x128xf32>
    %49 = vector.broadcast %48 : vector<1x128xf32> to vector<8x128xf32>
    %50 = arith.mulf %49, %44 : vector<8x128xf32>
    %cst_19 = arith.constant 1.000000e+00 : f32
    %51 = vector.broadcast %cst_19 : f32 to vector<1x128xf32>
    %52 = arith.subf %51, %48 : vector<1x128xf32>
    %53 = vector.broadcast %52 : vector<1x128xf32> to vector<8x128xf32>
    %54 = arith.mulf %53, %9 : vector<8x128xf32>
    %55 = arith.addf %50, %54 : vector<8x128xf32>
    %c1_i32 = arith.constant 1 : i32
    %56 = arith.truncf %55 : vector<8x128xf32> to vector<8x128xbf16>
    %c0_20 = arith.constant 0 : index
    %c0_21 = arith.constant 0 : index
    %57 = vector.load %arg2[%c0_20, %c0_21] : memref<128x384xbf16, #tpu.memory_space<vmem>>, vector<128x384xbf16>
    %cst_22 = arith.constant dense<0.000000e+00> : vector<8x384xf32>
    %58 = tpu.matmul %56, %57, %cst_22 {dimension_numbers = #tpu.dot_dimension_numbers<[1], [0], [0], [1], [0, 0, 1, 1], [], []>} : vector<8x128xbf16>, vector<128x384xbf16>, vector<8x384xf32> -> vector<8x384xf32>
    %59 = vector.broadcast %7 : vector<1x384xf32> to vector<8x384xf32>
    %60 = arith.addf %58, %59 : vector<8x384xf32>
    %c8_i32_23 = arith.constant 8 : i32
    %61 = arith.muli %c1_i32, %c8_i32_23 : i32
    %62 = tpu.assume_multiple %61, 8 : i32
    %63 = arith.index_cast %62 : i32 to index
    %c0_24 = arith.constant 0 : index
    %64 = vector.load %arg10[%63, %c0_24] : memref<64x384xf32, #tpu.memory_space<vmem>>, vector<8x384xf32>
    %65 = vector.extract_strided_slice %64 {offsets = [0, 0], sizes = [8, 128], strides = [1, 1]} : vector<8x384xf32> to vector<8x128xf32>
    %66 = vector.extract_strided_slice %60 {offsets = [0, 0], sizes = [8, 128], strides = [1, 1]} : vector<8x384xf32> to vector<8x128xf32>
    %67 = arith.addf %65, %66 : vector<8x128xf32>
    %68 = arith.negf %67 : vector<8x128xf32>
    %69 = math.exp %68 : vector<8x128xf32>
    %cst_25 = arith.constant 1.000000e+00 : f32
    %70 = vector.broadcast %cst_25 : f32 to vector<8x128xf32>
    %71 = arith.addf %70, %69 : vector<8x128xf32>
    %72 = arith.divf %70, %71 : vector<8x128xf32>
    %73 = vector.extract_strided_slice %64 {offsets = [0, 128], sizes = [8, 128], strides = [1, 1]} : vector<8x384xf32> to vector<8x128xf32>
    %74 = vector.extract_strided_slice %60 {offsets = [0, 128], sizes = [8, 128], strides = [1, 1]} : vector<8x384xf32> to vector<8x128xf32>
    %75 = arith.addf %73, %74 : vector<8x128xf32>
    %76 = arith.negf %75 : vector<8x128xf32>
    %77 = math.exp %76 : vector<8x128xf32>
    %cst_26 = arith.constant 1.000000e+00 : f32
    %78 = vector.broadcast %cst_26 : f32 to vector<8x128xf32>
    %79 = arith.addf %78, %77 : vector<8x128xf32>
    %80 = arith.divf %78, %79 : vector<8x128xf32>
    %81 = vector.extract_strided_slice %64 {offsets = [0, 256], sizes = [8, 128], strides = [1, 1]} : vector<8x384xf32> to vector<8x128xf32>
    %82 = vector.extract_strided_slice %60 {offsets = [0, 256], sizes = [8, 128], strides = [1, 1]} : vector<8x384xf32> to vector<8x128xf32>
    %83 = arith.mulf %72, %82 : vector<8x128xf32>
    %84 = arith.addf %81, %83 : vector<8x128xf32>
    %85 = math.tanh %84 : vector<8x128xf32>
    %cst_27 = arith.constant 1.000000e+00 : f32
    %86 = vector.broadcast %cst_27 : f32 to vector<8x128xf32>
    %87 = arith.subf %86, %80 : vector<8x128xf32>
    %88 = arith.mulf %87, %85 : vector<8x128xf32>
    %89 = arith.mulf %80, %55 : vector<8x128xf32>
    %90 = arith.addf %88, %89 : vector<8x128xf32>
    %91 = vector.broadcast %c1_i32 : i32 to vector<1x128xi32>
    %92 = arith.cmpi slt, %91, %8 : vector<1x128xi32>
    %93 = arith.extui %92 : vector<1x128xi1> to vector<1x128xi32>
    %94 = arith.sitofp %93 : vector<1x128xi32> to vector<1x128xf32>
    %95 = vector.broadcast %94 : vector<1x128xf32> to vector<8x128xf32>
    %96 = arith.mulf %95, %90 : vector<8x128xf32>
    %cst_28 = arith.constant 1.000000e+00 : f32
    %97 = vector.broadcast %cst_28 : f32 to vector<1x128xf32>
    %98 = arith.subf %97, %94 : vector<1x128xf32>
    %99 = vector.broadcast %98 : vector<1x128xf32> to vector<8x128xf32>
    %100 = arith.mulf %99, %55 : vector<8x128xf32>
    %101 = arith.addf %96, %100 : vector<8x128xf32>
    %c2_i32 = arith.constant 2 : i32
    %102 = arith.truncf %101 : vector<8x128xf32> to vector<8x128xbf16>
    %c0_29 = arith.constant 0 : index
    %c0_30 = arith.constant 0 : index
    %103 = vector.load %arg2[%c0_29, %c0_30] : memref<128x384xbf16, #tpu.memory_space<vmem>>, vector<128x384xbf16>
    %cst_31 = arith.constant dense<0.000000e+00> : vector<8x384xf32>
    %104 = tpu.matmul %102, %103, %cst_31 {dimension_numbers = #tpu.dot_dimension_numbers<[1], [0], [0], [1], [0, 0, 1, 1], [], []>} : vector<8x128xbf16>, vector<128x384xbf16>, vector<8x384xf32> -> vector<8x384xf32>
    %105 = vector.broadcast %7 : vector<1x384xf32> to vector<8x384xf32>
    %106 = arith.addf %104, %105 : vector<8x384xf32>
    %c8_i32_32 = arith.constant 8 : i32
    %107 = arith.muli %c2_i32, %c8_i32_32 : i32
    %108 = tpu.assume_multiple %107, 8 : i32
    %109 = arith.index_cast %108 : i32 to index
    %c0_33 = arith.constant 0 : index
    %110 = vector.load %arg10[%109, %c0_33] : memref<64x384xf32, #tpu.memory_space<vmem>>, vector<8x384xf32>
    %111 = vector.extract_strided_slice %110 {offsets = [0, 0], sizes = [8, 128], strides = [1, 1]} : vector<8x384xf32> to vector<8x128xf32>
    %112 = vector.extract_strided_slice %106 {offsets = [0, 0], sizes = [8, 128], strides = [1, 1]} : vector<8x384xf32> to vector<8x128xf32>
    %113 = arith.addf %111, %112 : vector<8x128xf32>
    %114 = arith.negf %113 : vector<8x128xf32>
    %115 = math.exp %114 : vector<8x128xf32>
    %cst_34 = arith.constant 1.000000e+00 : f32
    %116 = vector.broadcast %cst_34 : f32 to vector<8x128xf32>
    %117 = arith.addf %116, %115 : vector<8x128xf32>
    %118 = arith.divf %116, %117 : vector<8x128xf32>
    %119 = vector.extract_strided_slice %110 {offsets = [0, 128], sizes = [8, 128], strides = [1, 1]} : vector<8x384xf32> to vector<8x128xf32>
    %120 = vector.extract_strided_slice %106 {offsets = [0, 128], sizes = [8, 128], strides = [1, 1]} : vector<8x384xf32> to vector<8x128xf32>
    %121 = arith.addf %119, %120 : vector<8x128xf32>
    %122 = arith.negf %121 : vector<8x128xf32>
    %123 = math.exp %122 : vector<8x128xf32>
    %cst_35 = arith.constant 1.000000e+00 : f32
    %124 = vector.broadcast %cst_35 : f32 to vector<8x128xf32>
    %125 = arith.addf %124, %123 : vector<8x128xf32>
    %126 = arith.divf %124, %125 : vector<8x128xf32>
    %127 = vector.extract_strided_slice %110 {offsets = [0, 256], sizes = [8, 128], strides = [1, 1]} : vector<8x384xf32> to vector<8x128xf32>
    %128 = vector.extract_strided_slice %106 {offsets = [0, 256], sizes = [8, 128], strides = [1, 1]} : vector<8x384xf32> to vector<8x128xf32>
    %129 = arith.mulf %118, %128 : vector<8x128xf32>
    %130 = arith.addf %127, %129 : vector<8x128xf32>
    %131 = math.tanh %130 : vector<8x128xf32>
    %cst_36 = arith.constant 1.000000e+00 : f32
    %132 = vector.broadcast %cst_36 : f32 to vector<8x128xf32>
    %133 = arith.subf %132, %126 : vector<8x128xf32>
    %134 = arith.mulf %133, %131 : vector<8x128xf32>
    %135 = arith.mulf %126, %101 : vector<8x128xf32>
    %136 = arith.addf %134, %135 : vector<8x128xf32>
    %137 = vector.broadcast %c2_i32 : i32 to vector<1x128xi32>
    %138 = arith.cmpi slt, %137, %8 : vector<1x128xi32>
    %139 = arith.extui %138 : vector<1x128xi1> to vector<1x128xi32>
    %140 = arith.sitofp %139 : vector<1x128xi32> to vector<1x128xf32>
    %141 = vector.broadcast %140 : vector<1x128xf32> to vector<8x128xf32>
    %142 = arith.mulf %141, %136 : vector<8x128xf32>
    %cst_37 = arith.constant 1.000000e+00 : f32
    %143 = vector.broadcast %cst_37 : f32 to vector<1x128xf32>
    %144 = arith.subf %143, %140 : vector<1x128xf32>
    %145 = vector.broadcast %144 : vector<1x128xf32> to vector<8x128xf32>
    %146 = arith.mulf %145, %101 : vector<8x128xf32>
    %147 = arith.addf %142, %146 : vector<8x128xf32>
    %c3_i32 = arith.constant 3 : i32
    %148 = arith.truncf %147 : vector<8x128xf32> to vector<8x128xbf16>
    %c0_38 = arith.constant 0 : index
    %c0_39 = arith.constant 0 : index
    %149 = vector.load %arg2[%c0_38, %c0_39] : memref<128x384xbf16, #tpu.memory_space<vmem>>, vector<128x384xbf16>
    %cst_40 = arith.constant dense<0.000000e+00> : vector<8x384xf32>
    %150 = tpu.matmul %148, %149, %cst_40 {dimension_numbers = #tpu.dot_dimension_numbers<[1], [0], [0], [1], [0, 0, 1, 1], [], []>} : vector<8x128xbf16>, vector<128x384xbf16>, vector<8x384xf32> -> vector<8x384xf32>
    %151 = vector.broadcast %7 : vector<1x384xf32> to vector<8x384xf32>
    %152 = arith.addf %150, %151 : vector<8x384xf32>
    %c8_i32_41 = arith.constant 8 : i32
    %153 = arith.muli %c3_i32, %c8_i32_41 : i32
    %154 = tpu.assume_multiple %153, 8 : i32
    %155 = arith.index_cast %154 : i32 to index
    %c0_42 = arith.constant 0 : index
    %156 = vector.load %arg10[%155, %c0_42] : memref<64x384xf32, #tpu.memory_space<vmem>>, vector<8x384xf32>
    %157 = vector.extract_strided_slice %156 {offsets = [0, 0], sizes = [8, 128], strides = [1, 1]} : vector<8x384xf32> to vector<8x128xf32>
    %158 = vector.extract_strided_slice %152 {offsets = [0, 0], sizes = [8, 128], strides = [1, 1]} : vector<8x384xf32> to vector<8x128xf32>
    %159 = arith.addf %157, %158 : vector<8x128xf32>
    %160 = arith.negf %159 : vector<8x128xf32>
    %161 = math.exp %160 : vector<8x128xf32>
    %cst_43 = arith.constant 1.000000e+00 : f32
    %162 = vector.broadcast %cst_43 : f32 to vector<8x128xf32>
    %163 = arith.addf %162, %161 : vector<8x128xf32>
    %164 = arith.divf %162, %163 : vector<8x128xf32>
    %165 = vector.extract_strided_slice %156 {offsets = [0, 128], sizes = [8, 128], strides = [1, 1]} : vector<8x384xf32> to vector<8x128xf32>
    %166 = vector.extract_strided_slice %152 {offsets = [0, 128], sizes = [8, 128], strides = [1, 1]} : vector<8x384xf32> to vector<8x128xf32>
    %167 = arith.addf %165, %166 : vector<8x128xf32>
    %168 = arith.negf %167 : vector<8x128xf32>
    %169 = math.exp %168 : vector<8x128xf32>
    %cst_44 = arith.constant 1.000000e+00 : f32
    %170 = vector.broadcast %cst_44 : f32 to vector<8x128xf32>
    %171 = arith.addf %170, %169 : vector<8x128xf32>
    %172 = arith.divf %170, %171 : vector<8x128xf32>
    %173 = vector.extract_strided_slice %156 {offsets = [0, 256], sizes = [8, 128], strides = [1, 1]} : vector<8x384xf32> to vector<8x128xf32>
    %174 = vector.extract_strided_slice %152 {offsets = [0, 256], sizes = [8, 128], strides = [1, 1]} : vector<8x384xf32> to vector<8x128xf32>
    %175 = arith.mulf %164, %174 : vector<8x128xf32>
    %176 = arith.addf %173, %175 : vector<8x128xf32>
    %177 = math.tanh %176 : vector<8x128xf32>
    %cst_45 = arith.constant 1.000000e+00 : f32
    %178 = vector.broadcast %cst_45 : f32 to vector<8x128xf32>
    %179 = arith.subf %178, %172 : vector<8x128xf32>
    %180 = arith.mulf %179, %177 : vector<8x128xf32>
    %181 = arith.mulf %172, %147 : vector<8x128xf32>
    %182 = arith.addf %180, %181 : vector<8x128xf32>
    %183 = vector.broadcast %c3_i32 : i32 to vector<1x128xi32>
    %184 = arith.cmpi slt, %183, %8 : vector<1x128xi32>
    %185 = arith.extui %184 : vector<1x128xi1> to vector<1x128xi32>
    %186 = arith.sitofp %185 : vector<1x128xi32> to vector<1x128xf32>
    %187 = vector.broadcast %186 : vector<1x128xf32> to vector<8x128xf32>
    %188 = arith.mulf %187, %182 : vector<8x128xf32>
    %cst_46 = arith.constant 1.000000e+00 : f32
    %189 = vector.broadcast %cst_46 : f32 to vector<1x128xf32>
    %190 = arith.subf %189, %186 : vector<1x128xf32>
    %191 = vector.broadcast %190 : vector<1x128xf32> to vector<8x128xf32>
    %192 = arith.mulf %191, %147 : vector<8x128xf32>
    %193 = arith.addf %188, %192 : vector<8x128xf32>
    %c4_i32 = arith.constant 4 : i32
    %194 = arith.truncf %193 : vector<8x128xf32> to vector<8x128xbf16>
    %c0_47 = arith.constant 0 : index
    %c0_48 = arith.constant 0 : index
    %195 = vector.load %arg2[%c0_47, %c0_48] : memref<128x384xbf16, #tpu.memory_space<vmem>>, vector<128x384xbf16>
    %cst_49 = arith.constant dense<0.000000e+00> : vector<8x384xf32>
    %196 = tpu.matmul %194, %195, %cst_49 {dimension_numbers = #tpu.dot_dimension_numbers<[1], [0], [0], [1], [0, 0, 1, 1], [], []>} : vector<8x128xbf16>, vector<128x384xbf16>, vector<8x384xf32> -> vector<8x384xf32>
    %197 = vector.broadcast %7 : vector<1x384xf32> to vector<8x384xf32>
    %198 = arith.addf %196, %197 : vector<8x384xf32>
    %c8_i32_50 = arith.constant 8 : i32
    %199 = arith.muli %c4_i32, %c8_i32_50 : i32
    %200 = tpu.assume_multiple %199, 8 : i32
    %201 = arith.index_cast %200 : i32 to index
    %c0_51 = arith.constant 0 : index
    %202 = vector.load %arg10[%201, %c0_51] : memref<64x384xf32, #tpu.memory_space<vmem>>, vector<8x384xf32>
    %203 = vector.extract_strided_slice %202 {offsets = [0, 0], sizes = [8, 128], strides = [1, 1]} : vector<8x384xf32> to vector<8x128xf32>
    %204 = vector.extract_strided_slice %198 {offsets = [0, 0], sizes = [8, 128], strides = [1, 1]} : vector<8x384xf32> to vector<8x128xf32>
    %205 = arith.addf %203, %204 : vector<8x128xf32>
    %206 = arith.negf %205 : vector<8x128xf32>
    %207 = math.exp %206 : vector<8x128xf32>
    %cst_52 = arith.constant 1.000000e+00 : f32
    %208 = vector.broadcast %cst_52 : f32 to vector<8x128xf32>
    %209 = arith.addf %208, %207 : vector<8x128xf32>
    %210 = arith.divf %208, %209 : vector<8x128xf32>
    %211 = vector.extract_strided_slice %202 {offsets = [0, 128], sizes = [8, 128], strides = [1, 1]} : vector<8x384xf32> to vector<8x128xf32>
    %212 = vector.extract_strided_slice %198 {offsets = [0, 128], sizes = [8, 128], strides = [1, 1]} : vector<8x384xf32> to vector<8x128xf32>
    %213 = arith.addf %211, %212 : vector<8x128xf32>
    %214 = arith.negf %213 : vector<8x128xf32>
    %215 = math.exp %214 : vector<8x128xf32>
    %cst_53 = arith.constant 1.000000e+00 : f32
    %216 = vector.broadcast %cst_53 : f32 to vector<8x128xf32>
    %217 = arith.addf %216, %215 : vector<8x128xf32>
    %218 = arith.divf %216, %217 : vector<8x128xf32>
    %219 = vector.extract_strided_slice %202 {offsets = [0, 256], sizes = [8, 128], strides = [1, 1]} : vector<8x384xf32> to vector<8x128xf32>
    %220 = vector.extract_strided_slice %198 {offsets = [0, 256], sizes = [8, 128], strides = [1, 1]} : vector<8x384xf32> to vector<8x128xf32>
    %221 = arith.mulf %210, %220 : vector<8x128xf32>
    %222 = arith.addf %219, %221 : vector<8x128xf32>
    %223 = math.tanh %222 : vector<8x128xf32>
    %cst_54 = arith.constant 1.000000e+00 : f32
    %224 = vector.broadcast %cst_54 : f32 to vector<8x128xf32>
    %225 = arith.subf %224, %218 : vector<8x128xf32>
    %226 = arith.mulf %225, %223 : vector<8x128xf32>
    %227 = arith.mulf %218, %193 : vector<8x128xf32>
    %228 = arith.addf %226, %227 : vector<8x128xf32>
    %229 = vector.broadcast %c4_i32 : i32 to vector<1x128xi32>
    %230 = arith.cmpi slt, %229, %8 : vector<1x128xi32>
    %231 = arith.extui %230 : vector<1x128xi1> to vector<1x128xi32>
    %232 = arith.sitofp %231 : vector<1x128xi32> to vector<1x128xf32>
    %233 = vector.broadcast %232 : vector<1x128xf32> to vector<8x128xf32>
    %234 = arith.mulf %233, %228 : vector<8x128xf32>
    %cst_55 = arith.constant 1.000000e+00 : f32
    %235 = vector.broadcast %cst_55 : f32 to vector<1x128xf32>
    %236 = arith.subf %235, %232 : vector<1x128xf32>
    %237 = vector.broadcast %236 : vector<1x128xf32> to vector<8x128xf32>
    %238 = arith.mulf %237, %193 : vector<8x128xf32>
    %239 = arith.addf %234, %238 : vector<8x128xf32>
    %c5_i32 = arith.constant 5 : i32
    %240 = arith.truncf %239 : vector<8x128xf32> to vector<8x128xbf16>
    %c0_56 = arith.constant 0 : index
    %c0_57 = arith.constant 0 : index
    %241 = vector.load %arg2[%c0_56, %c0_57] : memref<128x384xbf16, #tpu.memory_space<vmem>>, vector<128x384xbf16>
    %cst_58 = arith.constant dense<0.000000e+00> : vector<8x384xf32>
    %242 = tpu.matmul %240, %241, %cst_58 {dimension_numbers = #tpu.dot_dimension_numbers<[1], [0], [0], [1], [0, 0, 1, 1], [], []>} : vector<8x128xbf16>, vector<128x384xbf16>, vector<8x384xf32> -> vector<8x384xf32>
    %243 = vector.broadcast %7 : vector<1x384xf32> to vector<8x384xf32>
    %244 = arith.addf %242, %243 : vector<8x384xf32>
    %c8_i32_59 = arith.constant 8 : i32
    %245 = arith.muli %c5_i32, %c8_i32_59 : i32
    %246 = tpu.assume_multiple %245, 8 : i32
    %247 = arith.index_cast %246 : i32 to index
    %c0_60 = arith.constant 0 : index
    %248 = vector.load %arg10[%247, %c0_60] : memref<64x384xf32, #tpu.memory_space<vmem>>, vector<8x384xf32>
    %249 = vector.extract_strided_slice %248 {offsets = [0, 0], sizes = [8, 128], strides = [1, 1]} : vector<8x384xf32> to vector<8x128xf32>
    %250 = vector.extract_strided_slice %244 {offsets = [0, 0], sizes = [8, 128], strides = [1, 1]} : vector<8x384xf32> to vector<8x128xf32>
    %251 = arith.addf %249, %250 : vector<8x128xf32>
    %252 = arith.negf %251 : vector<8x128xf32>
    %253 = math.exp %252 : vector<8x128xf32>
    %cst_61 = arith.constant 1.000000e+00 : f32
    %254 = vector.broadcast %cst_61 : f32 to vector<8x128xf32>
    %255 = arith.addf %254, %253 : vector<8x128xf32>
    %256 = arith.divf %254, %255 : vector<8x128xf32>
    %257 = vector.extract_strided_slice %248 {offsets = [0, 128], sizes = [8, 128], strides = [1, 1]} : vector<8x384xf32> to vector<8x128xf32>
    %258 = vector.extract_strided_slice %244 {offsets = [0, 128], sizes = [8, 128], strides = [1, 1]} : vector<8x384xf32> to vector<8x128xf32>
    %259 = arith.addf %257, %258 : vector<8x128xf32>
    %260 = arith.negf %259 : vector<8x128xf32>
    %261 = math.exp %260 : vector<8x128xf32>
    %cst_62 = arith.constant 1.000000e+00 : f32
    %262 = vector.broadcast %cst_62 : f32 to vector<8x128xf32>
    %263 = arith.addf %262, %261 : vector<8x128xf32>
    %264 = arith.divf %262, %263 : vector<8x128xf32>
    %265 = vector.extract_strided_slice %248 {offsets = [0, 256], sizes = [8, 128], strides = [1, 1]} : vector<8x384xf32> to vector<8x128xf32>
    %266 = vector.extract_strided_slice %244 {offsets = [0, 256], sizes = [8, 128], strides = [1, 1]} : vector<8x384xf32> to vector<8x128xf32>
    %267 = arith.mulf %256, %266 : vector<8x128xf32>
    %268 = arith.addf %265, %267 : vector<8x128xf32>
    %269 = math.tanh %268 : vector<8x128xf32>
    %cst_63 = arith.constant 1.000000e+00 : f32
    %270 = vector.broadcast %cst_63 : f32 to vector<8x128xf32>
    %271 = arith.subf %270, %264 : vector<8x128xf32>
    %272 = arith.mulf %271, %269 : vector<8x128xf32>
    %273 = arith.mulf %264, %239 : vector<8x128xf32>
    %274 = arith.addf %272, %273 : vector<8x128xf32>
    %275 = vector.broadcast %c5_i32 : i32 to vector<1x128xi32>
    %276 = arith.cmpi slt, %275, %8 : vector<1x128xi32>
    %277 = arith.extui %276 : vector<1x128xi1> to vector<1x128xi32>
    %278 = arith.sitofp %277 : vector<1x128xi32> to vector<1x128xf32>
    %279 = vector.broadcast %278 : vector<1x128xf32> to vector<8x128xf32>
    %280 = arith.mulf %279, %274 : vector<8x128xf32>
    %cst_64 = arith.constant 1.000000e+00 : f32
    %281 = vector.broadcast %cst_64 : f32 to vector<1x128xf32>
    %282 = arith.subf %281, %278 : vector<1x128xf32>
    %283 = vector.broadcast %282 : vector<1x128xf32> to vector<8x128xf32>
    %284 = arith.mulf %283, %239 : vector<8x128xf32>
    %285 = arith.addf %280, %284 : vector<8x128xf32>
    %c6_i32 = arith.constant 6 : i32
    %286 = arith.truncf %285 : vector<8x128xf32> to vector<8x128xbf16>
    %c0_65 = arith.constant 0 : index
    %c0_66 = arith.constant 0 : index
    %287 = vector.load %arg2[%c0_65, %c0_66] : memref<128x384xbf16, #tpu.memory_space<vmem>>, vector<128x384xbf16>
    %cst_67 = arith.constant dense<0.000000e+00> : vector<8x384xf32>
    %288 = tpu.matmul %286, %287, %cst_67 {dimension_numbers = #tpu.dot_dimension_numbers<[1], [0], [0], [1], [0, 0, 1, 1], [], []>} : vector<8x128xbf16>, vector<128x384xbf16>, vector<8x384xf32> -> vector<8x384xf32>
    %289 = vector.broadcast %7 : vector<1x384xf32> to vector<8x384xf32>
    %290 = arith.addf %288, %289 : vector<8x384xf32>
    %c8_i32_68 = arith.constant 8 : i32
    %291 = arith.muli %c6_i32, %c8_i32_68 : i32
    %292 = tpu.assume_multiple %291, 8 : i32
    %293 = arith.index_cast %292 : i32 to index
    %c0_69 = arith.constant 0 : index
    %294 = vector.load %arg10[%293, %c0_69] : memref<64x384xf32, #tpu.memory_space<vmem>>, vector<8x384xf32>
    %295 = vector.extract_strided_slice %294 {offsets = [0, 0], sizes = [8, 128], strides = [1, 1]} : vector<8x384xf32> to vector<8x128xf32>
    %296 = vector.extract_strided_slice %290 {offsets = [0, 0], sizes = [8, 128], strides = [1, 1]} : vector<8x384xf32> to vector<8x128xf32>
    %297 = arith.addf %295, %296 : vector<8x128xf32>
    %298 = arith.negf %297 : vector<8x128xf32>
    %299 = math.exp %298 : vector<8x128xf32>
    %cst_70 = arith.constant 1.000000e+00 : f32
    %300 = vector.broadcast %cst_70 : f32 to vector<8x128xf32>
    %301 = arith.addf %300, %299 : vector<8x128xf32>
    %302 = arith.divf %300, %301 : vector<8x128xf32>
    %303 = vector.extract_strided_slice %294 {offsets = [0, 128], sizes = [8, 128], strides = [1, 1]} : vector<8x384xf32> to vector<8x128xf32>
    %304 = vector.extract_strided_slice %290 {offsets = [0, 128], sizes = [8, 128], strides = [1, 1]} : vector<8x384xf32> to vector<8x128xf32>
    %305 = arith.addf %303, %304 : vector<8x128xf32>
    %306 = arith.negf %305 : vector<8x128xf32>
    %307 = math.exp %306 : vector<8x128xf32>
    %cst_71 = arith.constant 1.000000e+00 : f32
    %308 = vector.broadcast %cst_71 : f32 to vector<8x128xf32>
    %309 = arith.addf %308, %307 : vector<8x128xf32>
    %310 = arith.divf %308, %309 : vector<8x128xf32>
    %311 = vector.extract_strided_slice %294 {offsets = [0, 256], sizes = [8, 128], strides = [1, 1]} : vector<8x384xf32> to vector<8x128xf32>
    %312 = vector.extract_strided_slice %290 {offsets = [0, 256], sizes = [8, 128], strides = [1, 1]} : vector<8x384xf32> to vector<8x128xf32>
    %313 = arith.mulf %302, %312 : vector<8x128xf32>
    %314 = arith.addf %311, %313 : vector<8x128xf32>
    %315 = math.tanh %314 : vector<8x128xf32>
    %cst_72 = arith.constant 1.000000e+00 : f32
    %316 = vector.broadcast %cst_72 : f32 to vector<8x128xf32>
    %317 = arith.subf %316, %310 : vector<8x128xf32>
    %318 = arith.mulf %317, %315 : vector<8x128xf32>
    %319 = arith.mulf %310, %285 : vector<8x128xf32>
    %320 = arith.addf %318, %319 : vector<8x128xf32>
    %321 = vector.broadcast %c6_i32 : i32 to vector<1x128xi32>
    %322 = arith.cmpi slt, %321, %8 : vector<1x128xi32>
    %323 = arith.extui %322 : vector<1x128xi1> to vector<1x128xi32>
    %324 = arith.sitofp %323 : vector<1x128xi32> to vector<1x128xf32>
    %325 = vector.broadcast %324 : vector<1x128xf32> to vector<8x128xf32>
    %326 = arith.mulf %325, %320 : vector<8x128xf32>
    %cst_73 = arith.constant 1.000000e+00 : f32
    %327 = vector.broadcast %cst_73 : f32 to vector<1x128xf32>
    %328 = arith.subf %327, %324 : vector<1x128xf32>
    %329 = vector.broadcast %328 : vector<1x128xf32> to vector<8x128xf32>
    %330 = arith.mulf %329, %285 : vector<8x128xf32>
    %331 = arith.addf %326, %330 : vector<8x128xf32>
    %c7_i32 = arith.constant 7 : i32
    %332 = arith.truncf %331 : vector<8x128xf32> to vector<8x128xbf16>
    %c0_74 = arith.constant 0 : index
    %c0_75 = arith.constant 0 : index
    %333 = vector.load %arg2[%c0_74, %c0_75] : memref<128x384xbf16, #tpu.memory_space<vmem>>, vector<128x384xbf16>
    %cst_76 = arith.constant dense<0.000000e+00> : vector<8x384xf32>
    %334 = tpu.matmul %332, %333, %cst_76 {dimension_numbers = #tpu.dot_dimension_numbers<[1], [0], [0], [1], [0, 0, 1, 1], [], []>} : vector<8x128xbf16>, vector<128x384xbf16>, vector<8x384xf32> -> vector<8x384xf32>
    %335 = vector.broadcast %7 : vector<1x384xf32> to vector<8x384xf32>
    %336 = arith.addf %334, %335 : vector<8x384xf32>
    %c8_i32_77 = arith.constant 8 : i32
    %337 = arith.muli %c7_i32, %c8_i32_77 : i32
    %338 = tpu.assume_multiple %337, 8 : i32
    %339 = arith.index_cast %338 : i32 to index
    %c0_78 = arith.constant 0 : index
    %340 = vector.load %arg10[%339, %c0_78] : memref<64x384xf32, #tpu.memory_space<vmem>>, vector<8x384xf32>
    %341 = vector.extract_strided_slice %340 {offsets = [0, 0], sizes = [8, 128], strides = [1, 1]} : vector<8x384xf32> to vector<8x128xf32>
    %342 = vector.extract_strided_slice %336 {offsets = [0, 0], sizes = [8, 128], strides = [1, 1]} : vector<8x384xf32> to vector<8x128xf32>
    %343 = arith.addf %341, %342 : vector<8x128xf32>
    %344 = arith.negf %343 : vector<8x128xf32>
    %345 = math.exp %344 : vector<8x128xf32>
    %cst_79 = arith.constant 1.000000e+00 : f32
    %346 = vector.broadcast %cst_79 : f32 to vector<8x128xf32>
    %347 = arith.addf %346, %345 : vector<8x128xf32>
    %348 = arith.divf %346, %347 : vector<8x128xf32>
    %349 = vector.extract_strided_slice %340 {offsets = [0, 128], sizes = [8, 128], strides = [1, 1]} : vector<8x384xf32> to vector<8x128xf32>
    %350 = vector.extract_strided_slice %336 {offsets = [0, 128], sizes = [8, 128], strides = [1, 1]} : vector<8x384xf32> to vector<8x128xf32>
    %351 = arith.addf %349, %350 : vector<8x128xf32>
    %352 = arith.negf %351 : vector<8x128xf32>
    %353 = math.exp %352 : vector<8x128xf32>
    %cst_80 = arith.constant 1.000000e+00 : f32
    %354 = vector.broadcast %cst_80 : f32 to vector<8x128xf32>
    %355 = arith.addf %354, %353 : vector<8x128xf32>
    %356 = arith.divf %354, %355 : vector<8x128xf32>
    %357 = vector.extract_strided_slice %340 {offsets = [0, 256], sizes = [8, 128], strides = [1, 1]} : vector<8x384xf32> to vector<8x128xf32>
    %358 = vector.extract_strided_slice %336 {offsets = [0, 256], sizes = [8, 128], strides = [1, 1]} : vector<8x384xf32> to vector<8x128xf32>
    %359 = arith.mulf %348, %358 : vector<8x128xf32>
    %360 = arith.addf %357, %359 : vector<8x128xf32>
    %361 = math.tanh %360 : vector<8x128xf32>
    %cst_81 = arith.constant 1.000000e+00 : f32
    %362 = vector.broadcast %cst_81 : f32 to vector<8x128xf32>
    %363 = arith.subf %362, %356 : vector<8x128xf32>
    %364 = arith.mulf %363, %361 : vector<8x128xf32>
    %365 = arith.mulf %356, %331 : vector<8x128xf32>
    %366 = arith.addf %364, %365 : vector<8x128xf32>
    %367 = vector.broadcast %c7_i32 : i32 to vector<1x128xi32>
    %368 = arith.cmpi slt, %367, %8 : vector<1x128xi32>
    %369 = arith.extui %368 : vector<1x128xi1> to vector<1x128xi32>
    %370 = arith.sitofp %369 : vector<1x128xi32> to vector<1x128xf32>
    %371 = vector.broadcast %370 : vector<1x128xf32> to vector<8x128xf32>
    %372 = arith.mulf %371, %366 : vector<8x128xf32>
    %cst_82 = arith.constant 1.000000e+00 : f32
    %373 = vector.broadcast %cst_82 : f32 to vector<1x128xf32>
    %374 = arith.subf %373, %370 : vector<1x128xf32>
    %375 = vector.broadcast %374 : vector<1x128xf32> to vector<8x128xf32>
    %376 = arith.mulf %375, %331 : vector<8x128xf32>
    %377 = arith.addf %372, %376 : vector<8x128xf32>
    %c8_i32_83 = arith.constant 8 : i32
    %c0_84 = arith.constant 0 : index
    %c0_85 = arith.constant 0 : index
    %378 = vector.load %arg6[%c0_84, %c0_85] : memref<8x128xf32, #tpu.memory_space<vmem>>, vector<8x128xf32>
    %379 = tpu.concatenate %377, %378 in 1 : vector<8x128xf32>, vector<8x128xf32> -> vector<8x256xf32>
    %c0_86 = arith.constant 0 : index
    %c0_87 = arith.constant 0 : index
    %380 = vector.load %arg7[%c0_86, %c0_87] : memref<256x128xf32, #tpu.memory_space<vmem>>, vector<256x128xf32>
    %cst_88 = arith.constant dense<0.000000e+00> : vector<8x128xf32>
    %381 = tpu.matmul %379, %380, %cst_88 {dimension_numbers = #tpu.dot_dimension_numbers<[1], [0], [0], [1], [0, 0, 1, 1], [], []>} : vector<8x256xf32>, vector<256x128xf32>, vector<8x128xf32> -> vector<8x128xf32>
    %c0_89 = arith.constant 0 : index
    %c0_90 = arith.constant 0 : index
    %382 = vector.load %arg8[%c0_89, %c0_90] : memref<1x128xf32, #tpu.memory_space<vmem>>, vector<1x128xf32>
    %383 = vector.broadcast %382 : vector<1x128xf32> to vector<8x128xf32>
    %384 = arith.addf %381, %383 : vector<8x128xf32>
    %c0_91 = arith.constant 0 : index
    %c0_92 = arith.constant 0 : index
    %385 = vector.load %arg9[%c0_91, %c0_92] : memref<8x128xf32, #tpu.memory_space<vmem>>, vector<8x128xf32>
    tpu.vector_store %arg9[%c0_91, %c0_92], %384 {strides = array<i32>} : memref<8x128xf32, #tpu.memory_space<vmem>>, vector<8x128xf32>,
    return
  }
}

</mosaic_0001>

<bundles_post_ra>
// kernel: reverse.1
= control target key start
LH: loop header
LB: loop body
LE: loop exit
PB: predicated region body
PF: predicated region fallthrough
CT: control target
= control target key end

     0   :  { %v2_v0 = vlaneseq  ;;  %s105_s0 = inlined_call_operand.vmem [shape: f32[2,7], index: 0, kind: input, shape index: {}]   ;;  %s106_s1 = inlined_call_operand.vmem [shape: f32[2,7], index: 1, kind: output, shape index: {}]  }
   0x2   :  { %v3_v1 = vsub.s32 6, %v2_v0 }
   0x4   :  { %4 = vset.pattern.permute.xlu0 %v3_v1 }
   0x5   :  { %v20_v2 = vld [vmem:[%s105_s0] sm:$0x3] }
   0x6   :  { %21 = vst [vmem:[#allocation1] sm:$0x3] %v20_v2 }
   0xd   :  { %v38_v3 = vld [vmem:[#allocation1] sm:$0x3] }
   0xe   :  { %39 = vst [vmem:[#allocation0] sm:$0x3] %v38_v3 }
  0x15   :  { %v40_v4 = vld [vmem:[#allocation0] sm:$0xff] }
  0x16   :  { %41 = vperm.xlu0 %4, %v40_v4  }
  0x95   :  { %v42_v5 = vpop.permute.xlu0 %41 }
  0x96   :  { %43 = vst [vmem:[#allocation2] sm:$0xff] %v42_v5 }
  0x9d   :  { %v47_v6 = vld [vmem:[#allocation2] sm:$0x3] }
  0x9e   :  { %49 = vst [vmem:[#allocation3] sm:$0x3] %v47_v6 }
  0xa5   :  { %v65_v7 = vld [vmem:[#allocation3] sm:$0x3] }
  0xa6   :  { %66 = vst [vmem:[%s106_s1] sm:$0x3] %v65_v7 }

// kernel: reverse.4
= control target key start
LH: loop header
LB: loop body
LE: loop exit
PB: predicated region body
PF: predicated region fallthrough
CT: control target
= control target key end

     0   :  { %v2_v0 = vlaneseq  ;;  %s105_s0 = inlined_call_operand.vmem [shape: f32[2,5], index: 0, kind: input, shape index: {}]   ;;  %s106_s1 = inlined_call_operand.vmem [shape: f32[2,5], index: 1, kind: output, shape index: {}]  }
   0x2   :  { %v3_v1 = vsub.s32 4, %v2_v0 }
   0x4   :  { %4 = vset.pattern.permute.xlu0 %v3_v1 }
   0x5   :  { %v20_v2 = vld [vmem:[%s105_s0] sm:$0x3] }
   0x6   :  { %21 = vst [vmem:[#allocation1] sm:$0x3] %v20_v2 }
   0xd   :  { %v38_v3 = vld [vmem:[#allocation1] sm:$0x3] }
   0xe   :  { %39 = vst [vmem:[#allocation0] sm:$0x3] %v38_v3 }
  0x15   :  { %v40_v4 = vld [vmem:[#allocation0] sm:$0xff] }
  0x16   :  { %41 = vperm.xlu0 %4, %v40_v4  }
  0x95   :  { %v42_v5 = vpop.permute.xlu0 %41 }
  0x96   :  { %43 = vst [vmem:[#allocation2] sm:$0xff] %v42_v5 }
  0x9d   :  { %v47_v6 = vld [vmem:[#allocation2] sm:$0x3] }
  0x9e   :  { %49 = vst [vmem:[#allocation3] sm:$0x3] %v47_v6 }
  0xa5   :  { %v65_v7 = vld [vmem:[#allocation3] sm:$0x3] }
  0xa6   :  { %66 = vst [vmem:[%s106_s1] sm:$0x3] %v65_v7 }

// kernel: forward.1
= control target key start
LH: loop header
LB: loop body
LE: loop exit
PB: predicated region body
PF: predicated region fallthrough
CT: control target
= control target key end

     0   :  { %14 = vsyncpa [#allocation4], 0  ;;  %s2357_s30 = smov [#allocation3]   ;;  %s3163_s0 = inlined_call_operand.vmem [shape: bf16[64,128], index: 0, kind: input, shape index: {}]   ;;  %s3164_s1 = inlined_call_operand.vmem [shape: bf16[128,384], index: 1, kind: input, shape index: {}]   ;;  %s3165_s2 = inlined_call_operand.hbm [shape: bf16[128,384], index: 2, kind: input, shape index: {}]   ;;  %s3166_s3 = inlined_call_operand.vmem [shape: f32[1,384], index: 3, kind: input, shape index: {}]   ;;  %s3167_s4 = inlined_call_operand.vmem [shape: f32[1,384], index: 4, kind: input, shape index: {}]   ;;  %s3168_s5 = inlined_call_operand.vmem [shape: s32[1,128], index: 5, kind: input, shape index: {}]   ;;  %s3169_s6 = inlined_call_operand.vmem [shape: f32[8,128], index: 6, kind: input, shape index: {}]   ;;  %s3170_s7 = inlined_call_operand.vmem [shape: f32[256,128], index: 7, kind: input, shape index: {}]   ;;  %s3171_s8 = inlined_call_operand.vmem [shape: f32[1,128], index: 8, kind: input, shape index: {}]   ;;  %s3172_s9 = inlined_call_operand.vmem [shape: f32[8,128], index: 9, kind: output, shape index: {}]  }
   0x1   :  { %s24_s10 = sshll.u32 %s2357_s30, 4  ;;  %s2333_s13 = scalar_lea.hbm %s3165_s2, 3072  ;;  %s25_s10 = int_to_ptr.vmem [resolvable:$true] %s24_s10 }
   0x2   :  { %p2334_p0 = scmp.ne.s32.totalorder %s3165_s2, %s2333_s13  ;;  %p2337_p1 = scmp.lt.u32.totalorder %s2333_s13, %s3165_s2 }
   0x4   :  { %p2339_p2 = pnand %p2337_p1, %p2334_p0 }
   0x6   :  { %2342 = shalt.err (!%p2339_p2)
}
   0x7   :  { %s2343_s18 = scalar_lea.vmem %s25_s10, 3072  ;;  %p2348_p4 = scmp.lt.s32.totalorder %s25_s10, %s25_s10 }
   0x8   :  { %p2344_p3 = scmp.ne.s32.totalorder %s25_s10, %s2343_s18  ;;  %p2349_p5 = scmp.lt.s32.totalorder %s2343_s18, %s2343_s18 }
   0xa   :  { %p2350_p6 = por %p2349_p5, %p2348_p4 }
   0xc   :  { %p2351_p7 = pnand %p2350_p6, %p2344_p3 }
   0xe   :  { %2354 = shalt.err (!%p2351_p7)
}
   0xf   :  { %s2358_s19 = smov 192   ;;  %s2359_s20 = smov 12  }
  0x10   :  { %30 = dma.hbm_to_vmem [thread:$0]  %s3165_s2, 3072, %s25_s10, [#allocation4], %s2358_s19, %s2358_s19, %s2359_s20  }
  0x11   :  { %2355 = dma.done.wait [#allocation4], 3072  }
  0x12   :  { %2356 = vsyncadd [#allocation4], 4294964224  ;;  %v3173_v0 = vmov 0   ;;  %v2160_v1 = vld [vmem:[%s3164_s1 + $0x4] ss:$12 sps:$4 sm:$0xff]   ;;  %v2195_v31 = vld [vmem:[%s3163_s0 + $0x8] sm:$0xff]   ;;  %v89_v54 = vlaneseq }
  0x13   :  { %288 = vmatprep.mubr.bf16.mxu0 %v3173_v0  ;;  %v2162_v2 = vld [vmem:[%s3164_s1] ss:$12 sps:$4 sm:$0xff]   ;;  %256 = vmatprep.subr.bf16.mxu0 %v2160_v1  ;;  %v2163_v3 = vld [vmem:[%s3164_s1 + $0x1c] ss:$12 sps:$4 sm:$0xff]   ;;  %v2165_v4 = vld [vmem:[%s3164_s1 + $0x18] ss:$12 sps:$4 sm:$0xff]  }
  0x14   :  { %257 = vmatpush1.bf16.msra.mxu0 %v2162_v2  ;;  %v2166_v5 = vld [vmem:[%s3164_s1 + $0x34] ss:$12 sps:$4 sm:$0xff]   ;;  %v2168_v6 = vld [vmem:[%s3164_s1 + $0x30] ss:$12 sps:$4 sm:$0xff]   ;;  %v2169_v7 = vld [vmem:[%s3164_s1 + $0x4c] ss:$12 sps:$4 sm:$0xff]  }
  0x15   :  { %258 = vmatprep.subr.bf16.mxu0 %v2163_v3  ;;  %v2181_v8 = vld [vmem:[%s3164_s1 + $0x8] ss:$12 sps:$4 sm:$0xff]   ;;  %v2172_v10 = vld [vmem:[%s3164_s1 + $0x64] ss:$12 sps:$4 sm:$0xff]   ;;  %v2185_v11 = vld [vmem:[%s3164_s1 + $0x20] ss:$12 sps:$4 sm:$0xff]  }
  0x16   :  { %v2171_v9 = vld [vmem:[%s3164_s1 + $0x48] ss:$12 sps:$4 sm:$0xff]   ;;  %1938 = vmatprep.subr.bf16.mxu1 %v2181_v8  ;;  %v2186_v12 = vld [vmem:[%s3163_s0] sm:$0xff]   ;;  %v2194_v16 = vld [vmem:[%s3164_s1 + $0x50] ss:$12 sps:$4 sm:$0xff]   ;;  %v3175_v35 = vmov 0.0  }
  0x17   :  { %1939 = vmatpush3.bf16.msra.mxu1 %v2181_v8  ;;  %v2174_v13 = vld [vmem:[%s3164_s1 + $0x60] ss:$12 sps:$4 sm:$0xff]   ;;  %v2190_v14 = vld [vmem:[%s3164_s1 + $0x38] ss:$12 sps:$4 sm:$0xff]   ;;  %1954 = vmatprep.mubr.bf16.mxu1 %v2186_v12  ;;  %v2175_v15 = vld [vmem:[%s3164_s1 + $0x7c] ss:$12 sps:$4 sm:$0xff]  }
  0x18   :  { %259 = vmatpush1.bf16.msra.mxu0 %v2165_v4  ;;  %1940 = vmatprep.subr.bf16.mxu1 %v2185_v11  ;;  %v2177_v17 = vld [vmem:[%s3164_s1 + $0x78] ss:$12 sps:$4 sm:$0xff]   ;;  %v2178_v18 = vld [vmem:[%s3164_s1 + $0x94] ss:$12 sps:$4 sm:$0xff]   ;;  %v2180_v20 = vld [vmem:[%s3164_s1 + $0x90] ss:$12 sps:$4 sm:$0xff]  }
  0x19   :  { %260 = vmatprep.subr.bf16.mxu0 %v2166_v5  ;;  %v2199_v19 = vld [vmem:[%s3164_s1 + $0x68] ss:$12 sps:$4 sm:$0xff]   ;;  %v2182_v21 = vld [vmem:[%s3164_s1 + $0xac] ss:$12 sps:$4 sm:$0xff]   ;;  %v2495_v24 = vld [vmem:[#allocation3 + $0x4] ss:$12 sps:$4 sm:$0xff]  }
  0x1a   :  { %v2203_v22 = vld [vmem:[%s3164_s1 + $0x80] ss:$12 sps:$4 sm:$0xff]   ;;  %v2184_v23 = vld [vmem:[%s3164_s1 + $0xa8] ss:$12 sps:$4 sm:$0xff]   ;;  %v2208_v25 = vld [vmem:[%s3164_s1 + $0x98] ss:$12 sps:$4 sm:$0xff]  }
  0x1b   :  { %1941 = vmatpush3.bf16.msra.mxu1 %v2185_v11  ;;  %v2500_v26 = vld [vmem:[#allocation3] ss:$12 sps:$4 sm:$0xff]   ;;  %v2503_v27 = vld [vmem:[#allocation3 + $0x1c] ss:$12 sps:$4 sm:$0xff]   ;;  %v2509_v29 = vld [vmem:[#allocation3 + $0x18] ss:$12 sps:$4 sm:$0xff]  }
  0x1c   :  { %261 = vmatpush1.bf16.msra.mxu0 %v2168_v6  ;;  %1942 = vmatprep.subr.bf16.mxu1 %v2190_v14  ;;  %v2212_v28 = vld [vmem:[%s3164_s1 + $0xb0] ss:$12 sps:$4 sm:$0xff]   ;;  %v2513_v30 = vld [vmem:[#allocation3 + $0x34] ss:$12 sps:$4 sm:$0xff]   ;;  %v2522_v33 = vld [vmem:[#allocation3 + $0x4c] ss:$12 sps:$4 sm:$0xff]  }
  0x1d   :  { %262 = vmatprep.subr.bf16.mxu0 %v2169_v7  ;;  %v2519_v32 = vld [vmem:[#allocation3 + $0x30] ss:$12 sps:$4 sm:$0xff]   ;;  %v2524_v34 = vld [vmem:[#allocation3 + $0x8] ss:$12 sps:$4 sm:$0xff]   ;;  %v2538_v39 = vld [vmem:[#allocation3 + $0x20] ss:$12 sps:$4 sm:$0xff]  }
  0x1e   :  { %v2528_v36 = vld [vmem:[#allocation3 + $0x48] ss:$12 sps:$4 sm:$0xff]   ;;  %v2535_v38 = vld [vmem:[#allocation3 + $0x64] ss:$12 sps:$4 sm:$0xff]   ;;  %v2542_v40 = vld [vmem:[#allocation3 + $0x60] ss:$12 sps:$4 sm:$0xff]  }
  0x1f   :  { %1943 = vmatpush3.bf16.msra.mxu1 %v2190_v14  ;;  %v2204_v37 = vld [vmem:[%s3163_s0 + $0x10] sm:$0xff]   ;;  %v2545_v41 = vld [vmem:[#allocation3 + $0x7c] ss:$12 sps:$4 sm:$0xff]   ;;  %v2548_v42 = vld [vmem:[#allocation3 + $0x38] ss:$12 sps:$4 sm:$0xff]   ;;  %vm2362_vm0 = vmmov 0  }
  0x20   :  { %263 = vmatpush1.bf16.msra.mxu0 %v2171_v9  ;;  %1944 = vmatprep.subr.bf16.mxu1 %v2194_v16  ;;  %v2213_v43 = vld [vmem:[%s3163_s0 + $0x18] sm:$0xff]   ;;  %v2559_v45 = vld [vmem:[#allocation3 + $0x94] ss:$12 sps:$4 sm:$0xff]   ;;  %v2635_v55 = vshrl.u32 %v89_v54, 7 }
  0x21   :  { %264 = vmatprep.subr.bf16.mxu0 %v2172_v10  ;;  %v2555_v44 = vld [vmem:[#allocation3 + $0x78] ss:$12 sps:$4 sm:$0xff]   ;;  %v2562_v46 = vld [vmem:[#allocation3 + $0x50] ss:$12 sps:$4 sm:$0xff]   ;;  %v2574_v49 = vld [vmem:[#allocation3 + $0x68] ss:$12 sps:$4 sm:$0xff]  }
  0x22   :  { %v2568_v47 = vld [vmem:[#allocation3 + $0x90] ss:$12 sps:$4 sm:$0xff]   ;;  %v2571_v48 = vld [vmem:[#allocation3 + $0xac] ss:$12 sps:$4 sm:$0xff]   ;;  %v2578_v50 = vld [vmem:[#allocation3 + $0xa8] ss:$12 sps:$4 sm:$0xff]  }
  0x23   :  { %1945 = vmatpush3.bf16.msra.mxu1 %v2194_v16  ;;  %v2583_v51 = vld [vmem:[#allocation3 + $0x80] ss:$12 sps:$4 sm:$0xff]   ;;  %v2589_v52 = vld [vmem:[#allocation3 + $0x98] ss:$12 sps:$4 sm:$0xff]   ;;  %v2597_v53 = vld [vmem:[#allocation3 + $0xb0] ss:$12 sps:$4 sm:$0xff]  }
  0x24   :  { %265 = vmatpush1.bf16.msra.mxu0 %v2174_v13  ;;  %1946 = vmatprep.subr.bf16.mxu1 %v2199_v19  ;;  %v2638_v56 = vsub.s32 0, %v2635_v55  ;;  %v87_v57 = vld [vmem:[%s3166_s3] sm:$0x7]  ;;  %v95_v58 = vsub.s32 1, %v2635_v55  ;;  %v3177_v3 = vsub.s32 2, %v2635_v55 }
  0x25   :  { %266 = vmatprep.subr.bf16.mxu0 %v2175_v15 }
  0x26   :  { %v92_v60 = vrot.slane %v87_v57, %v2638_v56  ;;  %v96_v62 = vrot.slane %v87_v57, %v95_v58  ;;  %v2652_v5 = vrot.slane %v87_v57, %v3177_v3 }
  0x27   :  { %1947 = vmatpush3.bf16.msra.mxu1 %v2199_v19 }
  0x28   :  { %267 = vmatpush1.bf16.msra.mxu0 %v2177_v17  ;;  %1948 = vmatprep.subr.bf16.mxu1 %v2203_v22 }
  0x29   :  { %268 = vmatprep.subr.bf16.mxu0 %v2178_v18 }
  0x2b   :  { %1949 = vmatpush3.bf16.msra.mxu1 %v2203_v22 }
  0x2c   :  { %269 = vmatpush1.bf16.msra.mxu0 %v2180_v20  ;;  %1950 = vmatprep.subr.bf16.mxu1 %v2208_v25 }
  0x2d   :  { %270 = vmatprep.subr.bf16.mxu0 %v2182_v21 }
  0x2f   :  { %1951 = vmatpush3.bf16.msra.mxu1 %v2208_v25 }
  0x30   :  { %271 = vmatpush1.bf16.msra.mxu0 %v2184_v23  ;;  %1952 = vmatprep.subr.bf16.mxu1 %v2212_v28 }
  0x31   :  { %596 = vmatprep.subr.bf16.mxu0 %v2495_v24 }
  0x33   :  { %289 = vmatmul.mubr.bf16.vlgmr.msra.gmra.mrb[0].mxu0 %v2186_v12  ;;  %1953 = vmatpush3.bf16.msra.mxu1 %v2212_v28 }
  0x34   :  { %597 = vmatpush1.bf16.msra.mxu0 %v2500_v26  ;;  %298 = vmatprep.mubr.bf16.mxu0 %v3173_v0 }
  0x35   :  { %598 = vmatprep.subr.bf16.mxu0 %v2503_v27  ;;  %1962 = vmatprep.subr.bf16.mxu1 %v3175_v35 }
  0x36   :  { %1955 = vmatmul.mubr.bf16.vlgmr.msra.gmra.mrb[0].mxu1 %v2195_v31 }
  0x37   :  { %1963 = vmatpush3.bf16.msra.mxu1 %v2524_v34  ;;  %1958 = vmatprep.mubr.bf16.mxu1 %v2204_v37 }
  0x38   :  { %599 = vmatpush1.bf16.msra.mxu0 %v2509_v29  ;;  %1964 = vmatprep.subr.bf16.mxu1 %v3175_v35 }
  0x39   :  { %600 = vmatprep.subr.bf16.mxu0 %v2513_v30 }
  0x3b   :  { %299 = vmatmul.mubr.bf16.gmra.mrb[4].mxu0 %v2195_v31  ;;  %1965 = vmatpush3.bf16.msra.mxu1 %v2538_v39 }
  0x3c   :  { %601 = vmatpush1.bf16.msra.mxu0 %v2519_v32  ;;  %308 = vmatprep.mubr.bf16.mxu0 %v3173_v0 }
  0x3d   :  { %602 = vmatprep.subr.bf16.mxu0 %v2522_v33  ;;  %1966 = vmatprep.subr.bf16.mxu1 %v3175_v35 }
  0x3e   :  { %1959 = vmatmul.mubr.bf16.gmra.mrb[4].mxu1 %v2213_v43 }
  0x3f   :  { %1967 = vmatpush3.bf16.msra.mxu1 %v2548_v42  ;;  %1978 = vmatprep.mubr.msk.bf16.mxu1 %vm2362_vm0, %v3175_v35 }
  0x40   :  { %603 = vmatpush1.bf16.msra.mxu0 %v2528_v36  ;;  %1968 = vmatprep.subr.bf16.mxu1 %v3175_v35 }
  0x41   :  { %604 = vmatprep.subr.bf16.mxu0 %v2535_v38 }
  0x43   :  { %309 = vmatmul.mubr.bf16.gmra.mrb[8].mxu0 %v2204_v37  ;;  %1969 = vmatpush3.bf16.msra.mxu1 %v2562_v46 }
  0x44   :  { %605 = vmatpush1.bf16.msra.mxu0 %v2542_v40  ;;  %318 = vmatprep.mubr.bf16.mxu0 %v3173_v0 }
  0x45   :  { %606 = vmatprep.subr.bf16.mxu0 %v2545_v41  ;;  %1970 = vmatprep.subr.bf16.mxu1 %v3175_v35 }
  0x47   :  { %1971 = vmatpush3.bf16.msra.mxu1 %v2574_v49 }
  0x48   :  { %607 = vmatpush1.bf16.msra.mxu0 %v2555_v44  ;;  %1972 = vmatprep.subr.bf16.mxu1 %v3175_v35 }
  0x49   :  { %608 = vmatprep.subr.bf16.mxu0 %v2559_v45 }
  0x4b   :  { %319 = vmatmul.mubr.bf16.gmra.mrb[12].mxu0 %v2213_v43  ;;  %1973 = vmatpush3.bf16.msra.mxu1 %v2583_v51 }
  0x4c   :  { %609 = vmatpush1.bf16.msra.mxu0 %v2568_v47  ;;  %628 = vmatprep.mubr.bf16.mxu0 %v3173_v0 }
  0x4d   :  { %610 = vmatprep.subr.bf16.mxu0 %v2571_v48  ;;  %1974 = vmatprep.subr.bf16.mxu1 %v3175_v35 }
  0x4f   :  { %1975 = vmatpush3.bf16.msra.mxu1 %v2589_v52 }
  0x50   :  { %611 = vmatpush1.bf16.msra.mxu0 %v2578_v50  ;;  %1976 = vmatprep.subr.bf16.mxu1 %v3175_v35 }
  0x51   :  { %724 = vmatprep.subr.bf16.mxu0 %v2495_v24 }
  0x53   :  { %629 = vmatmul.mubr.bf16.vlgmr.msra.gmra.mrb[16].mxu0 %v3173_v0  ;;  %1977 = vmatpush3.bf16.msra.mxu1 %v2597_v53 }
  0x54   :  { %725 = vmatpush1.bf16.msra.mxu0 %v2500_v26  ;;  %756 = vmatprep.mubr.bf16.mxu0 %v3173_v0 }
  0x55   :  { %726 = vmatprep.subr.bf16.mxu0 %v2503_v27  ;;  %1982 = vmatprep.subr.bf16.mxu1 %v3175_v35 }
  0x56   :  { %1979 = vmatmul.mubr.bf16.vlgmr.msra.gmra.mrb[8].mxu1 %v3173_v0 }
  0x57   :  { %1983 = vmatpush3.bf16.msra.mxu1 %v2524_v34  ;;  %1998 = vmatprep.mubr.msk.bf16.mxu1 %vm2362_vm0, %v3175_v35 }
  0x58   :  { %727 = vmatpush1.bf16.msra.mxu0 %v2509_v29  ;;  %1984 = vmatprep.subr.bf16.mxu1 %v3175_v35 }
  0x59   :  { %728 = vmatprep.subr.bf16.mxu0 %v2513_v30 }
  0x5b   :  { %1985 = vmatpush3.bf16.msra.mxu1 %v2538_v39 }
  0x5c   :  { %729 = vmatpush1.bf16.msra.mxu0 %v2519_v32  ;;  %1986 = vmatprep.subr.bf16.mxu1 %v3175_v35 }
  0x5d   :  { %730 = vmatprep.subr.bf16.mxu0 %v2522_v33 }
  0x5f   :  { %1987 = vmatpush3.bf16.msra.mxu1 %v2548_v42 }
  0x60   :  { %731 = vmatpush1.bf16.msra.mxu0 %v2528_v36  ;;  %1988 = vmatprep.subr.bf16.mxu1 %v3175_v35 }
  0x61   :  { %732 = vmatprep.subr.bf16.mxu0 %v2535_v38 }
  0x63   :  { %1989 = vmatpush3.bf16.msra.mxu1 %v2562_v46 }
  0x64   :  { %733 = vmatpush1.bf16.msra.mxu0 %v2542_v40  ;;  %1990 = vmatprep.subr.bf16.mxu1 %v3175_v35 }
  0x65   :  { %734 = vmatprep.subr.bf16.mxu0 %v2545_v41 }
  0x67   :  { %1991 = vmatpush3.bf16.msra.mxu1 %v2574_v49 }
  0x68   :  { %735 = vmatpush1.bf16.msra.mxu0 %v2555_v44  ;;  %1992 = vmatprep.subr.bf16.mxu1 %v3175_v35 }
  0x69   :  { %736 = vmatprep.subr.bf16.mxu0 %v2559_v45 }
  0x6b   :  { %1993 = vmatpush3.bf16.msra.mxu1 %v2583_v51 }
  0x6c   :  { %737 = vmatpush1.bf16.msra.mxu0 %v2568_v47  ;;  %1994 = vmatprep.subr.bf16.mxu1 %v3175_v35 }
  0x6d   :  { %738 = vmatprep.subr.bf16.mxu0 %v2571_v48 }
  0x6f   :  { %1995 = vmatpush3.bf16.msra.mxu1 %v2589_v52 }
  0x70   :  { %739 = vmatpush1.bf16.msra.mxu0 %v2578_v50  ;;  %1996 = vmatprep.subr.bf16.mxu1 %v3175_v35 }
  0x71   :  { %852 = vmatprep.subr.bf16.mxu0 %v2495_v24 }
  0x73   :  { %1997 = vmatpush3.bf16.msra.mxu1 %v2597_v53 }
  0x74   :  { %2002 = vmatprep.subr.bf16.mxu1 %v3175_v35 }
 0x106   :  { %v290_v59 = vpop.f32.mrb[0].mxu0 }
 0x107   :  { %v292_v61 = vpop.f32.mrb[1].mxu0  ;;  %v291_v0 = vadd.f32 %v290_v59, %v92_v60 }
 0x108   :  { %v294_v63 = vpop.f32.mrb[2].mxu0  ;;  %v293_v3 = vadd.f32 %v292_v61, %v96_v62 }
 0x109   :  { %v2645_v1 = vadd.f32 %v294_v63, %v92_v60  ;;  %v296_v2 = vpop.f32.mrb[3].mxu0  ;;  %v1956_v11 = vpop.f32.mrb[0].mxu1 }
 0x10a   :  { %v2648_v4 = vadd.f32 %v296_v2, %v96_v62  ;;  %v2661_v14 = vadd.f32 %v1956_v11, %v2652_v5  ;;  %v363_v15 = vpop.f32.mrb[1].mxu1 }
 0x10b   :  { %v1957_v17 = vpop.f32.mrb[2].mxu1 }
 0x10c   :  { %v2666_v18 = vadd.f32 %v1957_v17, %v2652_v5  ;;  %v366_v19 = vpop.f32.mrb[3].mxu1 }
 0x10d   :  { %v2669_v20 = vadd.f32 %v366_v19, %v2652_v5 }
 0x10e   :  { %v300_v6 = vpop.f32.mrb[4].mxu0 }
 0x10f   :  { %v2654_v7 = vadd.f32 %v300_v6, %v92_v60  ;;  %v302_v8 = vpop.f32.mrb[5].mxu0 }
 0x110   :  { %v2656_v9 = vadd.f32 %v302_v8, %v96_v62  ;;  %v304_v10 = vpop.f32.mrb[6].mxu0 }
 0x111   :  { %v2658_v12 = vadd.f32 %v304_v10, %v92_v60  ;;  %v306_v13 = vpop.f32.mrb[7].mxu0  ;;  %v1960_v31 = vpop.f32.mrb[4].mxu1 }
 0x112   :  { %v2663_v16 = vadd.f32 %v306_v13, %v96_v62  ;;  %v2678_v54 = vadd.f32 %v1960_v31, %v2652_v5  ;;  %v379_v57 = vpop.f32.mrb[5].mxu1 }
 0x113   :  { %v2683_v2 = vadd.f32 %v379_v57, %v2652_v5  ;;  %v1961_v6 = vpop.f32.mrb[6].mxu1 }
 0x114   :  { %3179 = vst [vmem:[#allocation7_spill] sm:$0xff] %v2678_v54  ;;  %v2686_v8 = vadd.f32 %v1961_v6, %v2652_v5  ;;  %v382_v10 = vpop.f32.mrb[7].mxu1 }
 0x115   :  { %v2689_v11 = vadd.f32 %v382_v10, %v2652_v5 }
 0x116   :  { %v310_v21 = vpop.f32.mrb[8].mxu0  ;;  %3181 = vst [vmem:[#allocation9_spill] sm:$0xff] %v2686_v8 }
 0x117   :  { %v2671_v22 = vadd.f32 %v310_v21, %v92_v60  ;;  %v312_v23 = vpop.f32.mrb[9].mxu0  ;;  %3182 = vst [vmem:[#allocation10_spill] sm:$0xff] %v2689_v11 }
 0x118   :  { %v2673_v25 = vadd.f32 %v312_v23, %v96_v62  ;;  %v314_v28 = vpop.f32.mrb[10].mxu0 }
 0x119   :  { %v2675_v37 = vadd.f32 %v314_v28, %v92_v60  ;;  %v316_v43 = vpop.f32.mrb[11].mxu0  ;;  %v418_v28 = vld [vmem:[%s3167_s4] sm:$0x7] }
 0x11a   :  { %v2680_v63 = vadd.f32 %v316_v43, %v96_v62  ;;  %v2703_v6 = vrot.slane %v418_v28, %v2638_v56  ;;  %v2705_v10 = vrot.slane %v418_v28, %v95_v58 }
 0x11b   :  { %3178 = vst [vmem:[#allocation6_spill] sm:$0xff] %v2675_v37 }
 0x11c   :  { %3180 = vst [vmem:[#allocation8_spill] sm:$0xff] %v2680_v63 }
 0x11e   :  { %v320_v13 = vpop.f32.mrb[12].mxu0 }
 0x11f   :  { %v2691_v17 = vadd.f32 %v320_v13, %v92_v60  ;;  %v322_v19 = vpop.f32.mrb[13].mxu0 }
 0x120   :  { %v2693_v21 = vadd.f32 %v322_v19, %v96_v62  ;;  %v324_v23 = vpop.f32.mrb[14].mxu0 }
 0x121   :  { %3183 = vst [vmem:[#allocation11_spill] sm:$0xff] %v2691_v17  ;;  %v2698_v31 = vadd.f32 %v324_v23, %v92_v60  ;;  %v326_v43 = vpop.f32.mrb[15].mxu0  ;;  %v3187_v60 = vsub.s32 2, %v2635_v55  ;;  %v3188_v55 = vmov 0.0  }
 0x122   :  { %3184 = vst [vmem:[#allocation12_spill] sm:$0xff] %v2693_v21  ;;  %v2700_v57 = vadd.f32 %v326_v43, %v96_v62 }
 0x123   :  { %3185 = vst [vmem:[#allocation13_spill] sm:$0xff] %v2698_v31  ;;  %v2711_v61 = vrot.slane %v418_v28, %v3187_v60  ;;  %v3189_v60 = vmov 0  }
 0x124   :  { %3186 = vst [vmem:[#allocation14_spill] sm:$0xff] %v2700_v57 }
 0x126   :  { %v630_v13 = vpop.f32.mrb[16].mxu0 }
 0x127   :  { %v631_v19 = vadd.f32 %v630_v13, %v2703_v6  ;;  %v632_v35 = vpop.f32.mrb[17].mxu0 }
 0x128   :  { %v633_v8 = vadd.f32 %v632_v35, %v2705_v10  ;;  %v634_v54 = vpop.f32.mrb[18].mxu0 }
 0x129   :  { %v683_v21 = vadd.f32 %v631_v19, %v291_v0  ;;  %v635_v23 = vpop.f32.mrb[19].mxu0  ;;  %v671_v57 = vpop.f32.mrb[8].mxu1  ;;  %v364_v54 = vadd.f32 %v363_v15, %v2652_v5 }
 0x12a   :  { %v690_v31 = vadd.f32 %v633_v8, %v293_v3  ;;  %v1980_v11 = vpop.f32.mrb[9].mxu1  ;;  %v672_v0 = vadd.f32 %v671_v57, %v2711_v61 }
 0x12b   :  { %v1794_v17 = vmul.f32 -1.442695, %v683_v21  ;;  %v674_v63 = vpop.f32.mrb[10].mxu1 }
 0x12c   :  { %v1795_v43 = vmul.f32 -1.442695, %v690_v31  ;;  %v1981_v58 = vpop.f32.mrb[11].mxu1  ;;  %v2718_v63 = vld [vmem:[%s3168_s5] sm:$0x1] }
 0x12d   :  { %2228 = vpow2.f32 %v1794_v17  ;;  %vm704_vm1 = vcmp.gt.s32.totalorder %v2718_v63, 0  ;;  %vm832_vm2 = vcmp.gt.s32.totalorder %v2718_v63, 1  ;;  %vm960_vm3 = vcmp.gt.s32.totalorder %v2718_v63, 2 }
 0x12e   :  { %2230 = vpow2.f32 %v1795_v43  ;;  %v1796_v11 = vsel %vm704_vm1, 1.0, %v3188_v55  ;;  %vm1088_vm4 = vcmp.gt.s32.totalorder %v2718_v63, 3  ;;  %vm1216_vm5 = vcmp.gt.s32.totalorder %v2718_v63, 4 }
 0x12f   :  { %v714_v17 = vsub.f32 1.0, %v1796_v11  ;;  %v711_v13 = vrot.slane %v1796_v11, %v2638_v56  ;;  %vm1344_vm6 = vcmp.gt.s32.totalorder %v2718_v63, 5  ;;  %vm1472_vm7 = vcmp.gt.s32.totalorder %v2718_v63, 6 }
 0x131   :  { %v719_v31 = vrot.slane %v714_v17, %v2638_v56 }
 0x133   :  { %v721_v23 = vmul.f32 0.0, %v719_v31 }
 0x137   :  { %v2229_v37 = vpop.eup %2228 }
 0x138   :  { %v687_v59 = vadd.f32 1.0, %v2229_v37  ;;  %v2231_v35 = vpop.eup %2230 }
 0x139   :  { %v694_v62 = vadd.f32 1.0, %v2231_v35 }
 0x13a   :  { %2232 = vrcp.f32 %v687_v59 }
 0x13b   :  { %2234 = vrcp.f32 %v694_v62 }
 0x144   :  { %v2233_v3 = vpop.eup %2232 }
 0x145   :  { %v697_v8 = vmul.f32 %v2233_v3, %v672_v0  ;;  %v2235_v21 = vpop.eup %2234 }
 0x146   :  { %v700_v28 = vsub.f32 1.0, %v2235_v21  ;;  %v702_v5 = vmul.f32 0.0, %v2235_v21 }
 0x147   :  { %v698_v37 = vadd.f32 %v697_v8, %v364_v54 }
 0x149   :  { %2236 = vtanh.f32 %v698_v37 }
 0x153   :  { %v2237_v57 = vpop.eup %2236 }
 0x154   :  { %v701_v15 = vmul.f32 %v2237_v57, %v700_v28 }
 0x156   :  { %v703_v19 = vadd.f32 %v702_v5, %v701_v15 }
 0x158   :  { %v713_v43 = vmul.f32 %v711_v13, %v703_v19 }
 0x15a   :  { %v2724_v58 = vadd.f32 %v721_v23, %v713_v43 }
 0x15c   :  { %v723_v59 = vpack.c.bf16 %v2724_v58, %v2724_v58 }
 0x15e   :  { %757 = vmatmul.mubr.bf16.vlgmr.msra.gmra.mrb[20].mxu0 %v723_v59  ;;  %1999 = vmatmul.mubr.bf16.vlgmr.msra.gmra.mrb[12].mxu1 %v723_v59 }
 0x15f   :  { %853 = vmatpush1.bf16.msra.mxu0 %v2500_v26  ;;  %2003 = vmatpush3.bf16.msra.mxu1 %v2524_v34 }
 0x160   :  { %854 = vmatprep.subr.bf16.mxu0 %v2503_v27  ;;  %2004 = vmatprep.subr.bf16.mxu1 %v3188_v55 }
 0x161   :  { %884 = vmatprep.mubr.bf16.mxu0 %v3189_v60  ;;  %2018 = vmatprep.mubr.msk.bf16.mxu1 %vm2362_vm0, %v3188_v55 }
 0x163   :  { %855 = vmatpush1.bf16.msra.mxu0 %v2509_v29  ;;  %2005 = vmatpush3.bf16.msra.mxu1 %v2538_v39 }
 0x164   :  { %856 = vmatprep.subr.bf16.mxu0 %v2513_v30  ;;  %2006 = vmatprep.subr.bf16.mxu1 %v3188_v55 }
 0x167   :  { %857 = vmatpush1.bf16.msra.mxu0 %v2519_v32  ;;  %2007 = vmatpush3.bf16.msra.mxu1 %v2548_v42 }
 0x168   :  { %858 = vmatprep.subr.bf16.mxu0 %v2522_v33  ;;  %2008 = vmatprep.subr.bf16.mxu1 %v3188_v55 }
 0x16b   :  { %859 = vmatpush1.bf16.msra.mxu0 %v2528_v36  ;;  %2009 = vmatpush3.bf16.msra.mxu1 %v2562_v46 }
 0x16c   :  { %860 = vmatprep.subr.bf16.mxu0 %v2535_v38  ;;  %2010 = vmatprep.subr.bf16.mxu1 %v3188_v55 }
 0x16f   :  { %861 = vmatpush1.bf16.msra.mxu0 %v2542_v40  ;;  %2011 = vmatpush3.bf16.msra.mxu1 %v2574_v49 }
 0x170   :  { %862 = vmatprep.subr.bf16.mxu0 %v2545_v41  ;;  %2012 = vmatprep.subr.bf16.mxu1 %v3188_v55 }
 0x173   :  { %863 = vmatpush1.bf16.msra.mxu0 %v2555_v44  ;;  %2013 = vmatpush3.bf16.msra.mxu1 %v2583_v51 }
 0x174   :  { %864 = vmatprep.subr.bf16.mxu0 %v2559_v45  ;;  %2014 = vmatprep.subr.bf16.mxu1 %v3188_v55 }
 0x177   :  { %865 = vmatpush1.bf16.msra.mxu0 %v2568_v47  ;;  %2015 = vmatpush3.bf16.msra.mxu1 %v2589_v52 }
 0x178   :  { %866 = vmatprep.subr.bf16.mxu0 %v2571_v48  ;;  %2016 = vmatprep.subr.bf16.mxu1 %v3188_v55 }
 0x17b   :  { %867 = vmatpush1.bf16.msra.mxu0 %v2578_v50  ;;  %2017 = vmatpush3.bf16.msra.mxu1 %v2597_v53 }
 0x17c   :  { %980 = vmatprep.subr.bf16.mxu0 %v2495_v24  ;;  %2022 = vmatprep.subr.bf16.mxu1 %v3188_v55 }
 0x231   :  { %v758_v35 = vpop.f32.mrb[20].mxu0  ;;  %v799_v62 = vpop.f32.mrb[12].mxu1 }
 0x232   :  { %v759_v0 = vadd.f32 %v758_v35, %v2703_v6  ;;  %v760_v3 = vpop.f32.mrb[21].mxu0  ;;  %v2000_v54 = vpop.f32.mrb[13].mxu1  ;;  %v800_v43 = vadd.f32 %v799_v62, %v2711_v61 }
 0x233   :  { %v761_v8 = vadd.f32 %v760_v3, %v2705_v10  ;;  %v762_v37 = vpop.f32.mrb[22].mxu0  ;;  %v802_v11 = vpop.f32.mrb[14].mxu1 }
 0x234   :  { %v811_v17 = vadd.f32 %v759_v0, %v2645_v1  ;;  %v763_v21 = vpop.f32.mrb[23].mxu0  ;;  %v2001_v28 = vpop.f32.mrb[15].mxu1 }
 0x235   :  { %v818_v31 = vadd.f32 %v761_v8, %v2648_v4  ;;  %v1799_v4 = vsel %vm832_vm2, 1.0, %v3188_v55 }
 0x236   :  { %v1797_v57 = vmul.f32 -1.442695, %v811_v17  ;;  %v842_v3 = vsub.f32 1.0, %v1799_v4  ;;  %v839_v17 = vrot.slane %v1799_v4, %v2638_v56 }
 0x237   :  { %v1798_v5 = vmul.f32 -1.442695, %v818_v31 }
 0x238   :  { %2238 = vpow2.f32 %v1797_v57  ;;  %v847_v62 = vrot.slane %v842_v3, %v2638_v56 }
 0x239   :  { %2240 = vpow2.f32 %v1798_v5 }
 0x242   :  { %v2239_v15 = vpop.eup %2238 }
 0x243   :  { %v815_v13 = vadd.f32 1.0, %v2239_v15  ;;  %v2241_v19 = vpop.eup %2240 }
 0x244   :  { %v822_v23 = vadd.f32 1.0, %v2241_v19 }
 0x245   :  { %2242 = vrcp.f32 %v815_v13 }
 0x246   :  { %2244 = vrcp.f32 %v822_v23 }
 0x24f   :  { %v2243_v59 = vpop.eup %2242 }
 0x250   :  { %v825_v35 = vmul.f32 %v2243_v59, %v800_v43  ;;  %v2245_v0 = vpop.eup %2244 }
 0x251   :  { %v828_v54 = vsub.f32 1.0, %v2245_v0  ;;  %v830_v37 = vmul.f32 %v2245_v0, %v2724_v58 }
 0x252   :  { %v826_v1 = vadd.f32 %v825_v35, %v2669_v20  ;;  %v849_v20 = vmul.f32 %v847_v62, %v2724_v58 }
 0x254   :  { %2246 = vtanh.f32 %v826_v1 }
 0x25e   :  { %v2247_v8 = vpop.eup %2246 }
 0x25f   :  { %v829_v11 = vmul.f32 %v2247_v8, %v828_v54 }
 0x261   :  { %v831_v21 = vadd.f32 %v830_v37, %v829_v11 }
 0x263   :  { %v841_v28 = vmul.f32 %v839_v17, %v831_v21 }
 0x265   :  { %v2775_v31 = vadd.f32 %v849_v20, %v841_v28 }
 0x267   :  { %v851_v57 = vpack.c.bf16 %v2775_v31, %v2775_v31 }
 0x269   :  { %885 = vmatmul.mubr.bf16.vlgmr.msra.gmra.mrb[24].mxu0 %v851_v57  ;;  %2019 = vmatmul.mubr.bf16.vlgmr.msra.gmra.mrb[16].mxu1 %v851_v57 }
 0x26a   :  { %981 = vmatpush1.bf16.msra.mxu0 %v2500_v26  ;;  %2023 = vmatpush3.bf16.msra.mxu1 %v2524_v34 }
 0x26b   :  { %982 = vmatprep.subr.bf16.mxu0 %v2503_v27  ;;  %2024 = vmatprep.subr.bf16.mxu1 %v3188_v55 }
 0x26c   :  { %1012 = vmatprep.mubr.bf16.mxu0 %v3189_v60  ;;  %2038 = vmatprep.mubr.msk.bf16.mxu1 %vm2362_vm0, %v3188_v55 }
 0x26e   :  { %983 = vmatpush1.bf16.msra.mxu0 %v2509_v29  ;;  %2025 = vmatpush3.bf16.msra.mxu1 %v2538_v39 }
 0x26f   :  { %984 = vmatprep.subr.bf16.mxu0 %v2513_v30  ;;  %2026 = vmatprep.subr.bf16.mxu1 %v3188_v55 }
 0x272   :  { %985 = vmatpush1.bf16.msra.mxu0 %v2519_v32  ;;  %2027 = vmatpush3.bf16.msra.mxu1 %v2548_v42 }
 0x273   :  { %986 = vmatprep.subr.bf16.mxu0 %v2522_v33  ;;  %2028 = vmatprep.subr.bf16.mxu1 %v3188_v55 }
 0x276   :  { %987 = vmatpush1.bf16.msra.mxu0 %v2528_v36  ;;  %2029 = vmatpush3.bf16.msra.mxu1 %v2562_v46 }
 0x277   :  { %988 = vmatprep.subr.bf16.mxu0 %v2535_v38  ;;  %2030 = vmatprep.subr.bf16.mxu1 %v3188_v55 }
 0x27a   :  { %989 = vmatpush1.bf16.msra.mxu0 %v2542_v40  ;;  %2031 = vmatpush3.bf16.msra.mxu1 %v2574_v49 }
 0x27b   :  { %990 = vmatprep.subr.bf16.mxu0 %v2545_v41  ;;  %2032 = vmatprep.subr.bf16.mxu1 %v3188_v55 }
 0x27e   :  { %991 = vmatpush1.bf16.msra.mxu0 %v2555_v44  ;;  %2033 = vmatpush3.bf16.msra.mxu1 %v2583_v51 }
 0x27f   :  { %992 = vmatprep.subr.bf16.mxu0 %v2559_v45  ;;  %2034 = vmatprep.subr.bf16.mxu1 %v3188_v55 }
 0x282   :  { %993 = vmatpush1.bf16.msra.mxu0 %v2568_v47  ;;  %2035 = vmatpush3.bf16.msra.mxu1 %v2589_v52 }
 0x283   :  { %994 = vmatprep.subr.bf16.mxu0 %v2571_v48  ;;  %2036 = vmatprep.subr.bf16.mxu1 %v3188_v55 }
 0x286   :  { %995 = vmatpush1.bf16.msra.mxu0 %v2578_v50  ;;  %2037 = vmatpush3.bf16.msra.mxu1 %v2597_v53 }
 0x287   :  { %1108 = vmatprep.subr.bf16.mxu0 %v2495_v24  ;;  %2042 = vmatprep.subr.bf16.mxu1 %v3188_v55 }
 0x33c   :  { %v886_v58 = vpop.f32.mrb[24].mxu0  ;;  %v927_v5 = vpop.f32.mrb[16].mxu1 }
 0x33d   :  { %v887_v15 = vadd.f32 %v886_v58, %v2703_v6  ;;  %v888_v13 = vpop.f32.mrb[25].mxu0  ;;  %v2020_v19 = vpop.f32.mrb[17].mxu1  ;;  %v928_v62 = vadd.f32 %v927_v5, %v2711_v61 }
 0x33e   :  { %v889_v23 = vadd.f32 %v888_v13, %v2705_v10  ;;  %v890_v43 = vpop.f32.mrb[26].mxu0  ;;  %v930_v59 = vpop.f32.mrb[18].mxu1 }
 0x33f   :  { %v939_v35 = vadd.f32 %v887_v15, %v2654_v7  ;;  %v891_v1 = vpop.f32.mrb[27].mxu0  ;;  %v2021_v4 = vpop.f32.mrb[19].mxu1 }
 0x340   :  { %v946_v0 = vadd.f32 %v889_v23, %v2656_v9  ;;  %v1802_v9 = vsel %vm960_vm3, 1.0, %v3188_v55 }
 0x341   :  { %v1800_v3 = vmul.f32 -1.442695, %v939_v35  ;;  %v970_v57 = vsub.f32 1.0, %v1802_v9  ;;  %v967_v23 = vrot.slane %v1802_v9, %v2638_v56 }
 0x342   :  { %v1801_v54 = vmul.f32 -1.442695, %v946_v0 }
 0x343   :  { %2248 = vpow2.f32 %v1800_v3  ;;  %v975_v5 = vrot.slane %v970_v57, %v2638_v56 }
 0x344   :  { %2250 = vpow2.f32 %v1801_v54 }
 0x34d   :  { %v2249_v8 = vpop.eup %2248 }
 0x34e   :  { %v943_v37 = vadd.f32 1.0, %v2249_v8  ;;  %v2251_v11 = vpop.eup %2250 }
 0x34f   :  { %v950_v17 = vadd.f32 1.0, %v2251_v11 }
 0x350   :  { %2252 = vrcp.f32 %v943_v37 }
 0x351   :  { %2254 = vrcp.f32 %v950_v17 }
 0x35a   :  { %v2253_v21 = vpop.eup %2252 }
 0x35b   :  { %v953_v28 = vmul.f32 %v2253_v21, %v928_v62  ;;  %v2255_v20 = vpop.eup %2254 }
 0x35c   :  { %v956_v58 = vsub.f32 1.0, %v2255_v20  ;;  %v958_v13 = vmul.f32 %v2255_v20, %v2775_v31 }
 0x35d   :  { %v954_v7 = vadd.f32 %v953_v28, %v2661_v14  ;;  %v977_v14 = vmul.f32 %v975_v5, %v2775_v31 }
 0x35f   :  { %2256 = vtanh.f32 %v954_v7 }
 0x369   :  { %v2257_v15 = vpop.eup %2256 }
 0x36a   :  { %v957_v19 = vmul.f32 %v2257_v15, %v956_v58 }
 0x36c   :  { %v959_v43 = vadd.f32 %v958_v13, %v957_v19 }
 0x36e   :  { %v969_v59 = vmul.f32 %v967_v23, %v959_v43 }
 0x370   :  { %v2826_v35 = vadd.f32 %v977_v14, %v969_v59 }
 0x372   :  { %v979_v1 = vpack.c.bf16 %v2826_v35, %v2826_v35 }
 0x374   :  { %1013 = vmatmul.mubr.bf16.vlgmr.msra.gmra.mrb[28].mxu0 %v979_v1  ;;  %2039 = vmatmul.mubr.bf16.vlgmr.msra.gmra.mrb[20].mxu1 %v979_v1 }
 0x375   :  { %1109 = vmatpush1.bf16.msra.mxu0 %v2500_v26  ;;  %2043 = vmatpush3.bf16.msra.mxu1 %v2524_v34 }
 0x376   :  { %1110 = vmatprep.subr.bf16.mxu0 %v2503_v27  ;;  %2044 = vmatprep.subr.bf16.mxu1 %v3188_v55 }
 0x377   :  { %1140 = vmatprep.mubr.bf16.mxu0 %v3189_v60  ;;  %2058 = vmatprep.mubr.msk.bf16.mxu1 %vm2362_vm0, %v3188_v55 }
 0x379   :  { %1111 = vmatpush1.bf16.msra.mxu0 %v2509_v29  ;;  %2045 = vmatpush3.bf16.msra.mxu1 %v2538_v39 }
 0x37a   :  { %1112 = vmatprep.subr.bf16.mxu0 %v2513_v30  ;;  %2046 = vmatprep.subr.bf16.mxu1 %v3188_v55 }
 0x37d   :  { %1113 = vmatpush1.bf16.msra.mxu0 %v2519_v32  ;;  %2047 = vmatpush3.bf16.msra.mxu1 %v2548_v42 }
 0x37e   :  { %1114 = vmatprep.subr.bf16.mxu0 %v2522_v33  ;;  %2048 = vmatprep.subr.bf16.mxu1 %v3188_v55 }
 0x381   :  { %1115 = vmatpush1.bf16.msra.mxu0 %v2528_v36  ;;  %2049 = vmatpush3.bf16.msra.mxu1 %v2562_v46 }
 0x382   :  { %1116 = vmatprep.subr.bf16.mxu0 %v2535_v38  ;;  %2050 = vmatprep.subr.bf16.mxu1 %v3188_v55 }
 0x385   :  { %1117 = vmatpush1.bf16.msra.mxu0 %v2542_v40  ;;  %2051 = vmatpush3.bf16.msra.mxu1 %v2574_v49 }
 0x386   :  { %1118 = vmatprep.subr.bf16.mxu0 %v2545_v41  ;;  %2052 = vmatprep.subr.bf16.mxu1 %v3188_v55 }
 0x389   :  { %1119 = vmatpush1.bf16.msra.mxu0 %v2555_v44  ;;  %2053 = vmatpush3.bf16.msra.mxu1 %v2583_v51 }
 0x38a   :  { %1120 = vmatprep.subr.bf16.mxu0 %v2559_v45  ;;  %2054 = vmatprep.subr.bf16.mxu1 %v3188_v55 }
 0x38d   :  { %1121 = vmatpush1.bf16.msra.mxu0 %v2568_v47  ;;  %2055 = vmatpush3.bf16.msra.mxu1 %v2589_v52 }
 0x38e   :  { %1122 = vmatprep.subr.bf16.mxu0 %v2571_v48  ;;  %2056 = vmatprep.subr.bf16.mxu1 %v3188_v55 }
 0x391   :  { %1123 = vmatpush1.bf16.msra.mxu0 %v2578_v50  ;;  %2057 = vmatpush3.bf16.msra.mxu1 %v2597_v53 }
 0x392   :  { %1236 = vmatprep.subr.bf16.mxu0 %v2495_v24  ;;  %2062 = vmatprep.subr.bf16.mxu1 %v3188_v55 }
 0x447   :  { %v1014_v31 = vpop.f32.mrb[28].mxu0  ;;  %v1055_v4 = vpop.f32.mrb[20].mxu1 }
 0x448   :  { %v1015_v0 = vadd.f32 %v1014_v31, %v2703_v6  ;;  %v1016_v3 = vpop.f32.mrb[29].mxu0  ;;  %v2040_v54 = vpop.f32.mrb[21].mxu1  ;;  %v1056_v15 = vadd.f32 %v1055_v4, %v2711_v61 }
 0x449   :  { %v1017_v8 = vadd.f32 %v1016_v3, %v2705_v10  ;;  %v1018_v37 = vpop.f32.mrb[30].mxu0  ;;  %v1058_v11 = vpop.f32.mrb[22].mxu1 }
 0x44a   :  { %v1067_v17 = vadd.f32 %v1015_v0, %v2658_v12  ;;  %v1019_v62 = vpop.f32.mrb[31].mxu0  ;;  %v2041_v21 = vpop.f32.mrb[23].mxu1 }
 0x44b   :  { %v1074_v28 = vadd.f32 %v1017_v8, %v2663_v16  ;;  %v1805_v16 = vsel %vm1088_vm4, 1.0, %v3188_v55 }
 0x44c   :  { %v1803_v7 = vmul.f32 -1.442695, %v1067_v17  ;;  %v1098_v5 = vsub.f32 1.0, %v1805_v16  ;;  %v1095_v31 = vrot.slane %v1805_v16, %v2638_v56 }
 0x44d   :  { %v1804_v24 = vmul.f32 -1.442695, %v1074_v28 }
 0x44e   :  { %2258 = vpow2.f32 %v1803_v7  ;;  %v1103_v4 = vrot.slane %v1098_v5, %v2638_v56 }
 0x44f   :  { %2260 = vpow2.f32 %v1804_v24 }
 0x458   :  { %v2259_v9 = vpop.eup %2258 }
 0x459   :  { %v1071_v20 = vadd.f32 1.0, %v2259_v9  ;;  %v2261_v57 = vpop.eup %2260 }
 0x45a   :  { %v1078_v58 = vadd.f32 1.0, %v2261_v57 }
 0x45b   :  { %2262 = vrcp.f32 %v1071_v20 }
 0x45c   :  { %2264 = vrcp.f32 %v1078_v58 }
 0x465   :  { %v2263_v13 = vpop.eup %2262 }
 0x466   :  { %v1081_v19 = vmul.f32 %v2263_v13, %v1056_v15  ;;  %v2265_v23 = vpop.eup %2264 }
 0x467   :  { %v1084_v43 = vsub.f32 1.0, %v2265_v23  ;;  %v1086_v14 = vmul.f32 %v2265_v23, %v2826_v35 }
 0x468   :  { %v1082_v12 = vadd.f32 %v1081_v19, %v2666_v18  ;;  %v1105_v18 = vmul.f32 %v1103_v4, %v2826_v35  ;;  %v2940_v4 = vld [vmem:[#allocation3 + $0x1c] ss:$12 sps:$4 sm:$0xff]  }
 0x46a   :  { %2266 = vtanh.f32 %v1082_v12 }
 0x474   :  { %v2267_v59 = vpop.eup %2266 }
 0x475   :  { %v1085_v1 = vmul.f32 %v2267_v59, %v1084_v43 }
 0x477   :  { %v1087_v0 = vadd.f32 %v1086_v14, %v1085_v1  ;;  %v2934_v1 = vld [vmem:[#allocation3] ss:$12 sps:$4 sm:$0xff]  }
 0x479   :  { %v1097_v3 = vmul.f32 %v1095_v31, %v1087_v0  ;;  %v2937_v31 = vld [vmem:[#allocation3 + $0x8] ss:$12 sps:$4 sm:$0xff]   ;;  %v2947_v0 = vld [vmem:[#allocation3 + $0x18] ss:$12 sps:$4 sm:$0xff]  }
 0x47b   :  { %v2877_v54 = vadd.f32 %v1105_v18, %v1097_v3  ;;  %v2951_v3 = vld [vmem:[#allocation3 + $0x34] ss:$12 sps:$4 sm:$0xff]   ;;  %v2955_v18 = vld [vmem:[#allocation3 + $0x30] ss:$12 sps:$4 sm:$0xff]  }
 0x47d   :  { %v1107_v8 = vpack.c.bf16 %v2877_v54, %v2877_v54 }
 0x47f   :  { %1141 = vmatmul.mubr.bf16.vlgmr.msra.gmra.mrb[32].mxu0 %v1107_v8  ;;  %2059 = vmatmul.mubr.bf16.vlgmr.msra.gmra.mrb[24].mxu1 %v1107_v8  ;;  %v2963_v8 = vld [vmem:[#allocation3 + $0x48] ss:$12 sps:$4 sm:$0xff]  }
 0x480   :  { %1237 = vmatpush1.bf16.msra.mxu0 %v2500_v26  ;;  %2063 = vmatpush3.bf16.msra.mxu1 %v2524_v34  ;;  %v2914_v26 = vld [vmem:[#allocation3 + $0x4] ss:$12 sps:$4 sm:$0xff]  }
 0x481   :  { %1238 = vmatprep.subr.bf16.mxu0 %v2503_v27  ;;  %2064 = vmatprep.subr.bf16.mxu1 %v3188_v55 }
 0x482   :  { %1268 = vmatprep.mubr.bf16.mxu0 %v3189_v60  ;;  %2078 = vmatprep.mubr.msk.bf16.mxu1 %vm2362_vm0, %v3188_v55 }
 0x484   :  { %1239 = vmatpush1.bf16.msra.mxu0 %v2509_v29  ;;  %2065 = vmatpush3.bf16.msra.mxu1 %v2538_v39 }
 0x485   :  { %1240 = vmatprep.subr.bf16.mxu0 %v2513_v30  ;;  %2066 = vmatprep.subr.bf16.mxu1 %v3188_v55 }
 0x488   :  { %1241 = vmatpush1.bf16.msra.mxu0 %v2519_v32  ;;  %2067 = vmatpush3.bf16.msra.mxu1 %v2548_v42 }
 0x489   :  { %1242 = vmatprep.subr.bf16.mxu0 %v2522_v33  ;;  %2068 = vmatprep.subr.bf16.mxu1 %v3188_v55 }
 0x48c   :  { %1243 = vmatpush1.bf16.msra.mxu0 %v2528_v36  ;;  %2069 = vmatpush3.bf16.msra.mxu1 %v2562_v46 }
 0x48d   :  { %1244 = vmatprep.subr.bf16.mxu0 %v2535_v38  ;;  %2070 = vmatprep.subr.bf16.mxu1 %v3188_v55 }
 0x490   :  { %1245 = vmatpush1.bf16.msra.mxu0 %v2542_v40  ;;  %2071 = vmatpush3.bf16.msra.mxu1 %v2574_v49 }
 0x491   :  { %1246 = vmatprep.subr.bf16.mxu0 %v2545_v41  ;;  %2072 = vmatprep.subr.bf16.mxu1 %v3188_v55 }
 0x494   :  { %1247 = vmatpush1.bf16.msra.mxu0 %v2555_v44  ;;  %2073 = vmatpush3.bf16.msra.mxu1 %v2583_v51 }
 0x495   :  { %1248 = vmatprep.subr.bf16.mxu0 %v2559_v45  ;;  %2074 = vmatprep.subr.bf16.mxu1 %v3188_v55 }
 0x498   :  { %1249 = vmatpush1.bf16.msra.mxu0 %v2568_v47  ;;  %2075 = vmatpush3.bf16.msra.mxu1 %v2589_v52 }
 0x499   :  { %1250 = vmatprep.subr.bf16.mxu0 %v2571_v48  ;;  %2076 = vmatprep.subr.bf16.mxu1 %v3188_v55 }
 0x49c   :  { %1251 = vmatpush1.bf16.msra.mxu0 %v2578_v50  ;;  %2077 = vmatpush3.bf16.msra.mxu1 %v2597_v53 }
 0x49d   :  { %1364 = vmatprep.subr.bf16.mxu0 %v2914_v26  ;;  %2082 = vmatprep.subr.bf16.mxu1 %v3188_v55 }
 0x552   :  { %v1142_v27 = vpop.f32.mrb[32].mxu0  ;;  %v1183_v29 = vpop.f32.mrb[24].mxu1 }
 0x553   :  { %v1143_v30 = vadd.f32 %v1142_v27, %v2703_v6  ;;  %v1144_v32 = vpop.f32.mrb[33].mxu0  ;;  %v2060_v33 = vpop.f32.mrb[25].mxu1  ;;  %v1184_v24 = vadd.f32 %v1183_v29, %v2711_v61  ;;  %v2971_v27 = vld [vmem:[#allocation3 + $0x60] ss:$12 sps:$4 sm:$0xff]  }
 0x554   :  { %v1145_v34 = vadd.f32 %v1144_v32, %v2705_v10  ;;  %v1146_v36 = vpop.f32.mrb[34].mxu0  ;;  %v1186_v38 = vpop.f32.mrb[26].mxu1  ;;  %v3190_v29 = vld [vmem:[#allocation6_spill] sm:$0xff]  ;;  %v3191_v33 = vld [vmem:[#allocation8_spill] sm:$0xff] }
 0x555   :  { %v1195_v40 = vadd.f32 %v1143_v30, %v2671_v22  ;;  %v1147_v41 = vpop.f32.mrb[35].mxu0  ;;  %v2061_v35 = vpop.f32.mrb[27].mxu1 }
 0x556   :  { %v1202_v37 = vadd.f32 %v1145_v34, %v2673_v25  ;;  %v1808_v25 = vsel %vm1216_vm5, 1.0, %v3188_v55 }
 0x557   :  { %v1806_v11 = vmul.f32 -1.442695, %v1195_v40  ;;  %v1226_v58 = vsub.f32 1.0, %v1808_v25  ;;  %v1223_v16 = vrot.slane %v1808_v25, %v2638_v56 }
 0x558   :  { %v1807_v17 = vmul.f32 -1.442695, %v1202_v37 }
 0x559   :  { %2268 = vpow2.f32 %v1806_v11  ;;  %v1231_v23 = vrot.slane %v1226_v58, %v2638_v56 }
 0x55a   :  { %2270 = vpow2.f32 %v1807_v17  ;;  %v3192_v17 = vld [vmem:[#allocation10_spill] sm:$0xff] }
 0x563   :  { %v2269_v62 = vpop.eup %2268 }
 0x564   :  { %v1199_v21 = vadd.f32 1.0, %v2269_v62  ;;  %v2271_v28 = vpop.eup %2270 }
 0x565   :  { %v1206_v7 = vadd.f32 1.0, %v2271_v28 }
 0x566   :  { %2272 = vrcp.f32 %v1199_v21  ;;  %v1811_v21 = vsel %vm1344_vm6, 1.0, %v3188_v55 }
 0x567   :  { %2274 = vrcp.f32 %v1206_v7  ;;  %v1354_v7 = vsub.f32 1.0, %v1811_v21  ;;  %v1351_v25 = vrot.slane %v1811_v21, %v2638_v56 }
 0x570   :  { %v2273_v9 = vpop.eup %2272 }
 0x571   :  { %v1209_v20 = vmul.f32 %v2273_v9, %v1184_v24  ;;  %v2275_v57 = vpop.eup %2274 }
 0x572   :  { %v1212_v15 = vsub.f32 1.0, %v2275_v57  ;;  %v1214_v19 = vmul.f32 %v2275_v57, %v2877_v54  ;;  %v1359_v57 = vrot.slane %v1354_v7, %v2638_v56 }
 0x573   :  { %v1210_v22 = vadd.f32 %v1209_v20, %v2683_v2  ;;  %v1233_v2 = vmul.f32 %v1231_v23, %v2877_v54  ;;  %v2959_v54 = vld [vmem:[#allocation3 + $0x4c] ss:$12 sps:$4 sm:$0xff]  }
 0x574   :  { %v2321_v23 = vld [vmem:[#allocation3 + $0x38] ss:$12 sps:$4 sm:$0xff]  }
 0x575   :  { %2276 = vtanh.f32 %v1210_v22 }
 0x57f   :  { %v2277_v13 = vpop.eup %2276 }
 0x580   :  { %v1213_v12 = vmul.f32 %v2277_v13, %v1212_v15 }
 0x582   :  { %v1215_v5 = vadd.f32 %v1214_v19, %v1213_v12 }
 0x584   :  { %v1225_v43 = vmul.f32 %v1223_v16, %v1215_v5  ;;  %v2320_v16 = vld [vmem:[#allocation3 + $0x20] ss:$12 sps:$4 sm:$0xff]   ;;  %v2323_v5 = vld [vmem:[#allocation3 + $0x68] ss:$12 sps:$4 sm:$0xff]  }
 0x586   :  { %v2930_v59 = vadd.f32 %v1233_v2, %v1225_v43  ;;  %v2324_v43 = vld [vmem:[#allocation3 + $0x78] ss:$12 sps:$4 sm:$0xff]   ;;  %v2325_v2 = vld [vmem:[#allocation3 + $0x80] ss:$12 sps:$4 sm:$0xff]  }
 0x588   :  { %v1235_v14 = vpack.c.bf16 %v2930_v59, %v2930_v59  ;;  %v1361_v13 = vmul.f32 %v1359_v57, %v2930_v59 }
 0x58a   :  { %1269 = vmatmul.mubr.bf16.vlgmr.msra.gmra.mrb[36].mxu0 %v1235_v14  ;;  %2079 = vmatmul.mubr.bf16.vlgmr.msra.gmra.mrb[28].mxu1 %v1235_v14  ;;  %v2327_v14 = vld [vmem:[#allocation3 + $0x90] ss:$12 sps:$4 sm:$0xff]  }
 0x58b   :  { %1365 = vmatpush1.bf16.msra.mxu0 %v2934_v1  ;;  %2083 = vmatpush3.bf16.msra.mxu1 %v2937_v31 }
 0x58c   :  { %1366 = vmatprep.subr.bf16.mxu0 %v2940_v4  ;;  %2084 = vmatprep.subr.bf16.mxu1 %v3188_v55 }
 0x58d   :  { %1396 = vmatprep.mubr.bf16.mxu0 %v3189_v60  ;;  %2098 = vmatprep.mubr.msk.bf16.mxu1 %vm2362_vm0, %v3188_v55 }
 0x58f   :  { %1367 = vmatpush1.bf16.msra.mxu0 %v2947_v0  ;;  %2085 = vmatpush3.bf16.msra.mxu1 %v2538_v39  ;;  %v2967_v39 = vld [vmem:[#allocation3 + $0x64] ss:$12 sps:$4 sm:$0xff]  }
 0x590   :  { %1368 = vmatprep.subr.bf16.mxu0 %v2951_v3  ;;  %2086 = vmatprep.subr.bf16.mxu1 %v3188_v55 }
 0x593   :  { %1369 = vmatpush1.bf16.msra.mxu0 %v2955_v18  ;;  %2087 = vmatpush3.bf16.msra.mxu1 %v2548_v42  ;;  %v2975_v42 = vld [vmem:[#allocation3 + $0x7c] ss:$12 sps:$4 sm:$0xff]  }
 0x594   :  { %1370 = vmatprep.subr.bf16.mxu0 %v2959_v54  ;;  %2088 = vmatprep.subr.bf16.mxu1 %v3188_v55 }
 0x597   :  { %1371 = vmatpush1.bf16.msra.mxu0 %v2963_v8  ;;  %2089 = vmatpush3.bf16.msra.mxu1 %v2562_v46 }
 0x598   :  { %1372 = vmatprep.subr.bf16.mxu0 %v2967_v39  ;;  %2090 = vmatprep.subr.bf16.mxu1 %v3188_v55 }
 0x59b   :  { %1373 = vmatpush1.bf16.msra.mxu0 %v2971_v27  ;;  %2091 = vmatpush3.bf16.msra.mxu1 %v2574_v49 }
 0x59c   :  { %1374 = vmatprep.subr.bf16.mxu0 %v2975_v42  ;;  %2092 = vmatprep.subr.bf16.mxu1 %v3188_v55 }
 0x59f   :  { %1375 = vmatpush1.bf16.msra.mxu0 %v2555_v44  ;;  %2093 = vmatpush3.bf16.msra.mxu1 %v2583_v51 }
 0x5a0   :  { %1376 = vmatprep.subr.bf16.mxu0 %v2559_v45  ;;  %2094 = vmatprep.subr.bf16.mxu1 %v3188_v55 }
 0x5a3   :  { %1377 = vmatpush1.bf16.msra.mxu0 %v2568_v47  ;;  %2095 = vmatpush3.bf16.msra.mxu1 %v2589_v52 }
 0x5a4   :  { %1378 = vmatprep.subr.bf16.mxu0 %v2571_v48  ;;  %2096 = vmatprep.subr.bf16.mxu1 %v3188_v55 }
 0x5a7   :  { %1379 = vmatpush1.bf16.msra.mxu0 %v2578_v50  ;;  %2097 = vmatpush3.bf16.msra.mxu1 %v2597_v53 }
 0x5a8   :  { %1492 = vmatprep.subr.bf16.mxu0 %v2914_v26  ;;  %2102 = vmatprep.subr.bf16.mxu1 %v3188_v55 }
 0x65d   :  { %v1270_v44 = vpop.f32.mrb[36].mxu0  ;;  %v1311_v45 = vpop.f32.mrb[28].mxu1 }
 0x65e   :  { %v1271_v46 = vadd.f32 %v1270_v44, %v2703_v6  ;;  %v1272_v49 = vpop.f32.mrb[37].mxu0  ;;  %v2080_v47 = vpop.f32.mrb[29].mxu1  ;;  %v1312_v35 = vadd.f32 %v1311_v45, %v2711_v61  ;;  %v3193_v45 = vld [vmem:[#allocation11_spill] sm:$0xff] }
 0x65f   :  { %v1273_v51 = vadd.f32 %v1272_v49, %v2705_v10  ;;  %v1274_v52 = vpop.f32.mrb[38].mxu0  ;;  %v1314_v48 = vpop.f32.mrb[30].mxu1 }
 0x660   :  { %v1323_v30 = vadd.f32 %v1271_v46, %v3190_v29  ;;  %v1275_v32 = vpop.f32.mrb[39].mxu0  ;;  %v2081_v50 = vpop.f32.mrb[31].mxu1 }
 0x661   :  { %v1330_v53 = vadd.f32 %v1273_v51, %v3191_v33  ;;  %v3194_v51 = vld [vmem:[#allocation12_spill] sm:$0xff] }
 0x662   :  { %v1809_v34 = vmul.f32 -1.442695, %v1323_v30 }
 0x663   :  { %v1810_v26 = vmul.f32 -1.442695, %v1330_v53 }
 0x664   :  { %2278 = vpow2.f32 %v1809_v34 }
 0x665   :  { %2280 = vpow2.f32 %v1810_v26 }
 0x66e   :  { %v2279_v36 = vpop.eup %2278 }
 0x66f   :  { %v1327_v38 = vadd.f32 1.0, %v2279_v36  ;;  %v2281_v40 = vpop.eup %2280  ;;  %v3195_v36 = vld [vmem:[#allocation7_spill] sm:$0xff] }
 0x670   :  { %v1334_v41 = vadd.f32 1.0, %v2281_v40  ;;  %v1814_v40 = vsel %vm1472_vm7, 1.0, %v3188_v55 }
 0x671   :  { %2282 = vrcp.f32 %v1327_v38  ;;  %v1479_v21 = vrot.slane %v1814_v40, %v2638_v56 }
 0x672   :  { %2284 = vrcp.f32 %v1334_v41 }
 0x67b   :  { %v2283_v37 = vpop.eup %2282 }
 0x67c   :  { %v1337_v11 = vmul.f32 %v2283_v37, %v1312_v35  ;;  %v2285_v28 = vpop.eup %2284  ;;  %v1482_v35 = vsub.f32 1.0, %v1814_v40 }
 0x67d   :  { %v1340_v24 = vsub.f32 1.0, %v2285_v28  ;;  %v1342_v20 = vmul.f32 %v2285_v28, %v2930_v59  ;;  %v2326_v59 = vld [vmem:[#allocation3 + $0x94] ss:$12 sps:$4 sm:$0xff]  }
 0x67e   :  { %v1338_v62 = vadd.f32 %v1337_v11, %v3192_v17  ;;  %v1487_v28 = vrot.slane %v1482_v35, %v2638_v56  ;;  %v1635_v35 = vld [vmem:[%s3170_s7 + $0x78] sm:$0xff] }
 0x680   :  { %2286 = vtanh.f32 %v1338_v62 }
 0x68a   :  { %v2287_v9 = vpop.eup %2286 }
 0x68b   :  { %v1341_v22 = vmul.f32 %v2287_v9, %v1340_v24 }
 0x68d   :  { %v1343_v58 = vadd.f32 %v1342_v20, %v1341_v22  ;;  %v1636_v22 = vld [vmem:[%s3170_s7 + $0x80] sm:$0xff] }
 0x68f   :  { %v1353_v15 = vmul.f32 %v1351_v25, %v1343_v58  ;;  %v1637_v25 = vld [vmem:[%s3170_s7 + $0x88] sm:$0xff]  ;;  %v1620_v58 = vld [vmem:[%s3170_s7] sm:$0xff] }
 0x690   :  { %v2122_v57 = vpack.c.bf16 %v1637_v25, %v1636_v22 }
 0x691   :  { %v3003_v19 = vadd.f32 %v1361_v13, %v1353_v15  ;;  %v1621_v15 = vld [vmem:[%s3170_s7 + $0x8] sm:$0xff] }
 0x692   :  { %v2124_v13 = vpack.c.bf16 %v1621_v15, %v1620_v58  ;;  %v3197_v58 = vld [vmem:[#allocation14_spill] sm:$0xff] }
 0x693   :  { %v1363_v12 = vpack.c.bf16 %v3003_v19, %v3003_v19  ;;  %v1489_v9 = vmul.f32 %v1487_v28, %v3003_v19 }
 0x695   :  { %1397 = vmatmul.mubr.bf16.vlgmr.msra.gmra.mrb[40].mxu0 %v1363_v12  ;;  %2099 = vmatmul.mubr.bf16.vlgmr.msra.gmra.mrb[32].mxu1 %v1363_v12  ;;  %v1639_v12 = vld [vmem:[%s3170_s7 + $0x98] sm:$0xff] }
 0x696   :  { %1493 = vmatpush1.bf16.msra.mxu0 %v2934_v1  ;;  %2103 = vmatpush3.bf16.msra.mxu1 %v2937_v31  ;;  %v2328_v1 = vld [vmem:[#allocation3 + $0x98] ss:$12 sps:$4 sm:$0xff]  }
 0x697   :  { %1494 = vmatprep.subr.bf16.mxu0 %v2940_v4  ;;  %2104 = vmatprep.subr.bf16.mxu1 %v3188_v55  ;;  %v2329_v31 = vld [vmem:[#allocation3 + $0xac] ss:$12 sps:$4 sm:$0xff]   ;;  %v2330_v4 = vld [vmem:[#allocation3 + $0xa8] ss:$12 sps:$4 sm:$0xff]  }
 0x698   :  { %1524 = vmatprep.mubr.bf16.mxu0 %v3189_v60  ;;  %2118 = vmatprep.mubr.msk.bf16.mxu1 %vm2362_vm0, %v3188_v55  ;;  %v2322_v60 = vld [vmem:[#allocation3 + $0x50] ss:$12 sps:$4 sm:$0xff]  }
 0x69a   :  { %1495 = vmatpush1.bf16.msra.mxu0 %v2947_v0  ;;  %2105 = vmatpush3.bf16.msra.mxu1 %v2320_v16  ;;  %v2331_v0 = vld [vmem:[#allocation3 + $0xb0] ss:$12 sps:$4 sm:$0xff]  }
 0x69b   :  { %1496 = vmatprep.subr.bf16.mxu0 %v2951_v3  ;;  %2106 = vmatprep.subr.bf16.mxu1 %v3188_v55 }
 0x69e   :  { %1497 = vmatpush1.bf16.msra.mxu0 %v2955_v18  ;;  %2107 = vmatpush3.bf16.msra.mxu1 %v2321_v23  ;;  %v1622_v23 = vld [vmem:[%s3170_s7 + $0x10] sm:$0xff] }
 0x69f   :  { %1498 = vmatprep.subr.bf16.mxu0 %v2959_v54  ;;  %2108 = vmatprep.subr.bf16.mxu1 %v3188_v55 }
 0x6a2   :  { %1499 = vmatpush1.bf16.msra.mxu0 %v2963_v8  ;;  %2109 = vmatpush3.bf16.msra.mxu1 %v2322_v60  ;;  %v1623_v60 = vld [vmem:[%s3170_s7 + $0x18] sm:$0xff] }
 0x6a3   :  { %1500 = vmatprep.subr.bf16.mxu0 %v2967_v39  ;;  %2110 = vmatprep.subr.bf16.mxu1 %v3188_v55 }
 0x6a6   :  { %1501 = vmatpush1.bf16.msra.mxu0 %v2971_v27  ;;  %2111 = vmatpush3.bf16.msra.mxu1 %v2323_v5  ;;  %v2128_v5 = vpack.c.bf16 %v1623_v60, %v1622_v23 }
 0x6a7   :  { %1502 = vmatprep.subr.bf16.mxu0 %v2975_v42  ;;  %2112 = vmatprep.subr.bf16.mxu1 %v3188_v55 }
 0x6aa   :  { %1503 = vmatpush1.bf16.msra.mxu0 %v2324_v43  ;;  %2113 = vmatpush3.bf16.msra.mxu1 %v2325_v2  ;;  %v1640_v43 = vld [vmem:[%s3170_s7 + $0xa0] sm:$0xff]  ;;  %v1641_v2 = vld [vmem:[%s3170_s7 + $0xa8] sm:$0xff] }
 0x6ab   :  { %1504 = vmatprep.subr.bf16.mxu0 %v2326_v59  ;;  %2114 = vmatprep.subr.bf16.mxu1 %v3188_v55  ;;  %v2130_v59 = vpack.c.bf16 %v1641_v2, %v1640_v43  ;;  %v3198_v43 = vld [vmem:[#allocation9_spill] sm:$0xff] }
 0x6ae   :  { %1505 = vmatpush1.bf16.msra.mxu0 %v2327_v14  ;;  %2115 = vmatpush3.bf16.msra.mxu1 %v2328_v1  ;;  %v1624_v14 = vld [vmem:[%s3170_s7 + $0x20] sm:$0xff]  ;;  %v1625_v1 = vld [vmem:[%s3170_s7 + $0x28] sm:$0xff] }
 0x6af   :  { %1506 = vmatprep.subr.bf16.mxu0 %v2329_v31  ;;  %2116 = vmatprep.subr.bf16.mxu1 %v3188_v55  ;;  %v2132_v31 = vpack.c.bf16 %v1625_v1, %v1624_v14 }
 0x6b2   :  { %1507 = vmatpush1.bf16.msra.mxu0 %v2330_v4  ;;  %2117 = vmatpush3.bf16.msra.mxu1 %v2331_v0  ;;  %v1642_v4 = vld [vmem:[%s3170_s7 + $0xb0] sm:$0xff]  ;;  %v1643_v0 = vld [vmem:[%s3170_s7 + $0xb8] sm:$0xff] }
 0x6b3   :  { %2123 = vmatprep.subr.bf16.mxu0 %v2122_v57 }
 0x768   :  { %v1398_v3 = vpop.f32.mrb[40].mxu0  ;;  %v1439_v18 = vpop.f32.mrb[32].mxu1 }
 0x769   :  { %v1399_v54 = vadd.f32 %v1398_v3, %v2703_v6  ;;  %v1400_v8 = vpop.f32.mrb[41].mxu0  ;;  %v2100_v39 = vpop.f32.mrb[33].mxu1  ;;  %v1440_v53 = vadd.f32 %v1439_v18, %v2711_v61  ;;  %v2134_v3 = vpack.c.bf16 %v1643_v0, %v1642_v4  ;;  %v1626_v18 = vld [vmem:[%s3170_s7 + $0x30] sm:$0xff] }
 0x76a   :  { %v1401_v27 = vadd.f32 %v1400_v8, %v2705_v10  ;;  %v1402_v42 = vpop.f32.mrb[42].mxu0  ;;  %v1442_v44 = vpop.f32.mrb[34].mxu1  ;;  %v1644_v39 = vld [vmem:[%s3170_s7 + $0xc0] sm:$0xff] }
 0x76b   :  { %v1451_v46 = vadd.f32 %v1399_v54, %v3193_v45  ;;  %v1403_v49 = vpop.f32.mrb[43].mxu0  ;;  %v2101_v47 = vpop.f32.mrb[35].mxu1  ;;  %v1627_v54 = vld [vmem:[%s3170_s7 + $0x38] sm:$0xff]  ;;  %v1628_v42 = vld [vmem:[%s3170_s7 + $0x40] sm:$0xff]  ;;  %v1629_v45 = vld [vmem:[%s3170_s7 + $0x48] sm:$0xff] }
 0x76c   :  { %v1458_v52 = vadd.f32 %v1401_v27, %v3194_v51  ;;  %v2136_v8 = vpack.c.bf16 %v1627_v54, %v1626_v18  ;;  %v1645_v27 = vld [vmem:[%s3170_s7 + $0xc8] sm:$0xff]  ;;  %v1647_v49 = vld [vmem:[%s3170_s7 + $0xd8] sm:$0xff]  ;;  %v2140_v47 = vpack.c.bf16 %v1629_v45, %v1628_v42 }
 0x76d   :  { %v1812_v48 = vmul.f32 -1.442695, %v1451_v46  ;;  %v2138_v44 = vpack.c.bf16 %v1645_v27, %v1644_v39  ;;  %v1646_v46 = vld [vmem:[%s3170_s7 + $0xd0] sm:$0xff] }
 0x76e   :  { %v1813_v29 = vmul.f32 -1.442695, %v1458_v52  ;;  %v2142_v51 = vpack.c.bf16 %v1647_v49, %v1646_v46  ;;  %v1630_v52 = vld [vmem:[%s3170_s7 + $0x50] sm:$0xff] }
 0x76f   :  { %2288 = vpow2.f32 %v1812_v48  ;;  %v1631_v48 = vld [vmem:[%s3170_s7 + $0x58] sm:$0xff] }
 0x770   :  { %2290 = vpow2.f32 %v1813_v29  ;;  %v1648_v29 = vld [vmem:[%s3170_s7 + $0xe0] sm:$0xff] }
 0x779   :  { %v2289_v30 = vpop.eup %2288 }
 0x77a   :  { %v1455_v32 = vadd.f32 1.0, %v2289_v30  ;;  %v2291_v50 = vpop.eup %2290  ;;  %v1649_v30 = vld [vmem:[%s3170_s7 + $0xe8] sm:$0xff] }
 0x77b   :  { %v1462_v33 = vadd.f32 1.0, %v2291_v50  ;;  %v2146_v50 = vpack.c.bf16 %v1649_v30, %v1648_v29 }
 0x77c   :  { %2292 = vrcp.f32 %v1455_v32  ;;  %v2144_v32 = vpack.c.bf16 %v1631_v48, %v1630_v52 }
 0x77d   :  { %2294 = vrcp.f32 %v1462_v33  ;;  %v1632_v33 = vld [vmem:[%s3170_s7 + $0x60] sm:$0xff] }
 0x786   :  { %v2293_v34 = vpop.eup %2292 }
 0x787   :  { %v1465_v26 = vmul.f32 %v2293_v34, %v1440_v53  ;;  %v2295_v41 = vpop.eup %2294  ;;  %v1633_v53 = vld [vmem:[%s3170_s7 + $0x68] sm:$0xff]  ;;  %v1619_v34 = vld [vmem:[%s3169_s6] sm:$0xff] }
 0x788   :  { %v1468_v37 = vsub.f32 1.0, %v2295_v41  ;;  %v1470_v17 = vmul.f32 %v2295_v41, %v3003_v19  ;;  %v1638_v19 = vld [vmem:[%s3170_s7 + $0x90] sm:$0xff] }
 0x789   :  { %v1466_v38 = vadd.f32 %v1465_v26, %v3195_v36  ;;  %v2126_v16 = vpack.c.bf16 %v1639_v12, %v1638_v19  ;;  %v1650_v26 = vld [vmem:[%s3170_s7 + $0xf0] sm:$0xff]  ;;  %v1651_v36 = vld [vmem:[%s3170_s7 + $0xf8] sm:$0xff] }
 0x78a   :  { %v2150_v40 = vpack.c.bf16 %v1651_v36, %v1650_v26  ;;  %v1634_v41 = vld [vmem:[%s3170_s7 + $0x70] sm:$0xff] }
 0x78b   :  { %2296 = vtanh.f32 %v1466_v38  ;;  %v2148_v38 = vpack.c.bf16 %v1633_v53, %v1632_v33 }
 0x795   :  { %v2297_v11 = vpop.eup %2296 }
 0x796   :  { %v1469_v62 = vmul.f32 %v2297_v11, %v1468_v37  ;;  %v2152_v37 = vpack.c.bf16 %v1635_v35, %v1634_v41 }
 0x798   :  { %v1471_v7 = vadd.f32 %v1470_v17, %v1469_v62 }
 0x79a   :  { %v1481_v24 = vmul.f32 %v1479_v21, %v1471_v7 }
 0x79c   :  { %v3040_v20 = vadd.f32 %v1489_v9, %v1481_v24 }
 0x79e   :  { %v1491_v63 = vpack.c.bf16 %v3040_v20, %v3040_v20 }
 0x7a0   :  { %1525 = vmatmul.mubr.bf16.vlgmr.msra.gmra.mrb[44].mxu0 %v1491_v63  ;;  %2119 = vmatmul.mubr.bf16.vlgmr.msra.gmra.mrb[36].mxu1 %v1491_v63  ;;  %v3196_v63 = vld [vmem:[#allocation13_spill] sm:$0xff] }
 0x7a1   :  { %2125 = vmatpush3.bf16.msra.mxu0 %v2124_v13  ;;  %1723 = vmatprep.mubr.f32.mxu0 %v1619_v34 }
 0x7a2   :  { %2127 = vmatprep.subr.bf16.mxu0 %v2126_v16 }
 0x7a5   :  { %2129 = vmatpush3.bf16.msra.mxu0 %v2128_v5 }
 0x7a6   :  { %2131 = vmatprep.subr.bf16.mxu0 %v2130_v59  ;;  %v2332_v59 = vld [vmem:[%s3168_s5] sm:$0x1] }
 0x7a7   :  { %vm1600_vm8 = vcmp.gt.s32.totalorder %v2332_v59, 7 }
 0x7a8   :  { %v1817_v14 = vsel %vm1600_vm8, 1.0, %v3188_v55  ;;  %v1818_v55 = vld [vmem:[%s3171_s8] ss:$0 sm:$0xff] }
 0x7a9   :  { %2133 = vmatpush3.bf16.msra.mxu0 %v2132_v31  ;;  %v1610_v31 = vsub.f32 1.0, %v1817_v14  ;;  %v1607_v18 = vrot.slane %v1817_v14, %v2638_v56 }
 0x7aa   :  { %2135 = vmatprep.subr.bf16.mxu0 %v2134_v3 }
 0x7ab   :  { %v1615_v54 = vrot.slane %v1610_v31, %v2638_v56 }
 0x7ad   :  { %2137 = vmatpush3.bf16.msra.mxu0 %v2136_v8  ;;  %v1617_v27 = vmul.f32 %v1615_v54, %v3040_v20 }
 0x7ae   :  { %2139 = vmatprep.subr.bf16.mxu0 %v2138_v44 }
 0x7b1   :  { %2141 = vmatpush3.bf16.msra.mxu0 %v2140_v47 }
 0x7b2   :  { %2143 = vmatprep.subr.bf16.mxu0 %v2142_v51 }
 0x7b5   :  { %2145 = vmatpush3.bf16.msra.mxu0 %v2144_v32 }
 0x7b6   :  { %2147 = vmatprep.subr.bf16.mxu0 %v2146_v50 }
 0x7b9   :  { %2149 = vmatpush3.bf16.msra.mxu0 %v2148_v38 }
 0x7ba   :  { %2151 = vmatprep.subr.bf16.mxu0 %v2150_v40 }
 0x7bd   :  { %2153 = vmatpush3.bf16.msra.mxu0 %v2152_v37 }
 0x873   :  { %v1526_v11 = vpop.f32.mrb[44].mxu0  ;;  %v1567_v17 = vpop.f32.mrb[36].mxu1 }
 0x874   :  { %v1527_v62 = vadd.f32 %v1526_v11, %v2703_v6  ;;  %v1528_v21 = vpop.f32.mrb[45].mxu0  ;;  %v2120_v28 = vpop.f32.mrb[37].mxu1  ;;  %v1568_v60 = vadd.f32 %v1567_v17, %v2711_v61 }
 0x875   :  { %v1529_v7 = vadd.f32 %v1528_v21, %v2705_v10  ;;  %v1530_v24 = vpop.f32.mrb[46].mxu0  ;;  %v1570_v9 = vpop.f32.mrb[38].mxu1 }
 0x876   :  { %v1579_v22 = vadd.f32 %v1527_v62, %v3196_v63  ;;  %v1531_v25 = vpop.f32.mrb[47].mxu0  ;;  %v2121_v57 = vpop.f32.mrb[39].mxu1 }
 0x877   :  { %v1586_v15 = vadd.f32 %v1529_v7, %v3197_v58 }
 0x878   :  { %v1815_v13 = vmul.f32 -1.442695, %v1579_v22 }
 0x879   :  { %v1816_v19 = vmul.f32 -1.442695, %v1586_v15 }
 0x87a   :  { %2298 = vpow2.f32 %v1815_v13 }
 0x87b   :  { %2300 = vpow2.f32 %v1816_v19 }
 0x884   :  { %v2299_v12 = vpop.eup %2298 }
 0x885   :  { %v1583_v16 = vadd.f32 1.0, %v2299_v12  ;;  %v2301_v6 = vpop.eup %2300 }
 0x886   :  { %v1590_v23 = vadd.f32 1.0, %v2301_v6 }
 0x887   :  { %2302 = vrcp.f32 %v1583_v16 }
 0x888   :  { %2304 = vrcp.f32 %v1590_v23 }
 0x891   :  { %v2303_v10 = vpop.eup %2302 }
 0x892   :  { %v1593_v5 = vmul.f32 %v2303_v10, %v1568_v60  ;;  %v2305_v1 = vpop.eup %2304 }
 0x893   :  { %v1596_v4 = vsub.f32 1.0, %v2305_v1  ;;  %v1598_v61 = vmul.f32 %v2305_v1, %v3040_v20 }
 0x894   :  { %v1594_v2 = vadd.f32 %v1593_v5, %v3198_v43 }
 0x896   :  { %2306 = vtanh.f32 %v1594_v2 }
 0x8a0   :  { %v2307_v0 = vpop.eup %2306 }
 0x8a1   :  { %v1597_v3 = vmul.f32 %v2307_v0, %v1596_v4 }
 0x8a3   :  { %v1599_v8 = vadd.f32 %v1598_v61, %v1597_v3 }
 0x8a5   :  { %v1609_v39 = vmul.f32 %v1607_v18, %v1599_v8 }
 0x8a7   :  { %v1618_v42 = vadd.f32 %v1617_v27, %v1609_v39 }
 0x8a9   :  { %1724 = vmatmul.mubr.f32.vlgmr.msra.gmra.mrb[48].mxu0 %v1618_v42 }
 0x97c   :  { %v1935_v44 = vpop.f32.mrb[48].mxu0 }
 0x97d   :  { %v1936_v45 = vpop.f32.mrb[49].mxu0 }
 0x97e   :  { %v1937_v46 = vadd.f32 %v1936_v45, %v1935_v44 }
 0x980   :  { %v1726_v49 = vadd.f32 %v1937_v46, %v1818_v55 }
 0x982   :  { %1729 = vst [vmem:[%s3172_s9] sm:$0xff] %v1726_v49 }
 0x983   :  { %1734 = vsyncpa [#allocation4], 1 }

</bundles_post_ra>
